<compile_context>
chip_gen: v6e
topology: v6e:2x2x1
jax: 0.10.0
libtpu: 0.0.40
codegen_flags: <defaults>
</compile_context>

<pallas_src>
import functools

import jax
import jax.numpy as jnp
from jax import lax
from jax.experimental import pallas as pl
from jax.experimental.pallas import tpu as pltpu


def _round_up(x, m):
    return (x + m - 1) // m * m


def _gru_kernel(x_ref, wih_ref, whh_ref, bih_ref, bhn_ref, out_ref,
                gi_scr, h_scr, *, h_dtype, unroll):
    """One (batch-shard, time-block) grid step of a single-layer GRU.

    x_ref  : (Tblk, Bb, Hp)  matmul_dtype  streamed inputs (time-major, padded)
    wih_ref: (Hp, 3Hp)       matmul_dtype  input-side weights, gate order [r|z|n]
    whh_ref: (Hp, 3Hp)       h_dtype       hidden-side weights
    bih_ref: (1, 3Hp)        f32           b_ih with b_hr/b_hz folded in
    bhn_ref: (1, Hp)         f32           hidden-side n-gate bias (b_hn)
    out_ref: (Tblk, Bb, Hp)  f32           per-step hidden states
    gi_scr : (Tblk, Bb, 3Hp) f32 scratch   precomputed input-side gates
    h_scr  : (Bb, Hp)        f32 scratch   hidden state carried across time blocks
    """
    Tblk, Bb, Hp = out_ref.shape

    @pl.when(pl.program_id(1) == 0)
    def _():
        h_scr[...] = jnp.zeros_like(h_scr)        # h0 = 0 (nn.GRU default)

    # Input-side gates for the WHOLE time block: one big MXU matmul (M = Tblk*Bb),
    # hoisted off the serial recurrence.  b_ih (+ folded b_hr, b_hz) added here.
    x_blk = x_ref[...].reshape(Tblk * Bb, Hp)
    gi = jnp.dot(x_blk, wih_ref[...], preferred_element_type=jnp.float32)
    gi_scr[...] = (gi + bih_ref[...]).reshape(Tblk, Bb, 3 * Hp)

    # Hoisted loop invariants (JAX does not CSE broadcasts inside the loop).
    whh = whh_ref[...]                                   # (Hp, 3Hp), already h_dtype
    bhn = jnp.broadcast_to(bhn_ref[...], (Bb, Hp))       # n-gate hidden bias

    def step(i, h):
        gi_t = gi_scr[i]                                  # (Bb, 3Hp)
        gh = jnp.dot(h.astype(h_dtype), whh,
                     preferred_element_type=jnp.float32)  # (Bb, 3Hp)
        # Hp is a multiple of 128 -> these lane slices are tile-aligned free views.
        i_r, i_z, i_n = gi_t[:, :Hp], gi_t[:, Hp:2 * Hp], gi_t[:, 2 * Hp:]
        h_r, h_z, h_n = gh[:, :Hp], gh[:, Hp:2 * Hp], gh[:, 2 * Hp:]
        r = jax.nn.sigmoid(i_r + h_r)
        z = jax.nn.sigmoid(i_z + h_z)
        n = jnp.tanh(i_n + r * (h_n + bhn))               # PyTorch: r*(W_hn h + b_hn)
        h_new = n + z * (h - n)                           # == (1-z)*n + z*h
        out_ref[i] = h_new                                # lane-dense (Bb, Hp) store
        return h_new

    h_scr[...] = lax.fori_loop(0, Tblk, step, h_scr[...], unroll=unroll)


def gru_pallas(x_tbh, w_ih, w_hh, b_ih, b_hh, *,
               matmul_dtype=jnp.float32, hidden_matmul_dtype=jnp.float32,
               max_tblk=64, vmem_budget_bytes=8 << 20, batch_shards=None):
    """Single-layer unidirectional GRU with h0 = 0.

    x_tbh      : (T, B, H) time-major inputs (f32)
    w_ih, w_hh : (3H, H)   PyTorch layout, gate rows ordered [r | z | n]
    b_ih, b_hh : (3H,)
    returns    : out (T, B, H) f32, h_n (B, H) f32
    """
    T, B, H = x_tbh.shape
    Bp = _round_up(B, 8)          # sublane tile
    Hp = _round_up(H, 128)        # lane tile

    # Optional batch-shard grid axis (megacore on v7x); shards must stay 8-aligned.
    if batch_shards is None:
        batch_shards = 2 if (Bp % 16 == 0) else 1
    nb = batch_shards
    assert Bp % nb == 0 and (Bp // nb) % 8 == 0
    Bb = Bp // nb

    # Time-block size from a VMEM budget for the streamed/double-buffered pieces:
    #   x block (2 bufs, matmul_dtype) + out block (2 bufs, f32) + gi scratch (f32).
    in_item = jnp.dtype(matmul_dtype).itemsize
    per_step_bytes = 2 * Bb * Hp * in_item + 2 * Bb * Hp * 4 + Bb * 3 * Hp * 4
    Tblk = int(max(1, min(T, max_tblk, vmem_budget_bytes // per_step_bytes)))
    nT = pl.cdiv(T, Tblk)
    Tp = nT * Tblk                # pad T up to a multiple of Tblk (cdiv grid)

    # Adaptive unroll: fully unroll only when the per-step live set is small.
    live_bytes = Bb * 4 * Hp * 4  # h + 3 gate slices, f32
    if live_bytes <= (32 << 10):
        unroll = min(Tblk, 32)
    elif live_bytes <= (128 << 10):
        unroll = min(Tblk, 4)
    else:
        unroll = min(Tblk, 2)

    def pack_gates(w, dtype):
        # (3H, H) -> (Hp, 3Hp): transpose each gate block, zero-pad, concat, pre-cast.
        gates = [w[g * H:(g + 1) * H, :].T for g in range(3)]
        gates = [jnp.pad(g, ((0, Hp - H), (0, Hp - H))) for g in gates]
        return jnp.concatenate(gates, axis=1).astype(dtype)

    def pack_bias_vec(b):
        return jnp.concatenate(
            [jnp.pad(b[g * H:(g + 1) * H], (0, Hp - H)) for g in range(3)])

    wih_p = pack_gates(w_ih, matmul_dtype)                 # (Hp, 3Hp)
    whh_p = pack_gates(w_hh, hidden_matmul_dtype)          # (Hp, 3Hp)

    # Fold b_hr, b_hz into the input-side bias; only b_hn stays hidden-side
    # (because of the r * (W_hn h + b_hn) structure).
    b_fold = jnp.concatenate([b_ih[:H] + b_hh[:H],
                              b_ih[H:2 * H] + b_hh[H:2 * H],
                              b_ih[2 * H:3 * H]])
    bih_p = pack_bias_vec(b_fold).reshape(1, -1).astype(jnp.float32)       # (1, 3Hp)
    bhn_p = jnp.pad(b_hh[2 * H:3 * H], (0, Hp - H)).reshape(1, -1).astype(jnp.float32)

    # Zero padding is exact: padded hidden lanes stay identically 0 through the
    # recurrence (zero weight rows/cols + zero bias).  Padded batch rows / padded
    # trailing timesteps compute garbage but are sliced off below (and h_n is taken
    # from out[T-1], so padded timesteps never contaminate it).
    x_pad = jnp.pad(x_tbh.astype(jnp.float32),
                    ((0, Tp - T), (0, Bp - B), (0, Hp - H))).astype(matmul_dtype)

    out_pad = pl.pallas_call(
        functools.partial(_gru_kernel, h_dtype=hidden_matmul_dtype, unroll=unroll),
        out_shape=jax.ShapeDtypeStruct((Tp, Bp, Hp), jnp.float32),
        grid_spec=pltpu.PrefetchScalarGridSpec(
            num_scalar_prefetch=0,
            grid=(nb, nT),
            in_specs=[
                pl.BlockSpec((Tblk, Bb, Hp), lambda b, t: (t, b, 0)),   # streamed x
                pl.BlockSpec((Hp, 3 * Hp), lambda b, t: (0, 0)),        # resident W_ih
                pl.BlockSpec((Hp, 3 * Hp), lambda b, t: (0, 0)),        # resident W_hh
                pl.BlockSpec((1, 3 * Hp), lambda b, t: (0, 0)),         # folded b_ih
                pl.BlockSpec((1, Hp), lambda b, t: (0, 0)),             # b_hn
            ],
            out_specs=pl.BlockSpec((Tblk, Bb, Hp), lambda b, t: (t, b, 0)),
            scratch_shapes=[
                pltpu.VMEM((Tblk, Bb, 3 * Hp), jnp.float32),   # gi for this block
                pltpu.VMEM((Bb, Hp), jnp.float32),             # carried hidden state
            ],
        ),
        compiler_params=pltpu.CompilerParams(
            # batch shards independent -> "parallel" (megacore on v7x);
            # time recurrence is serial (scratch-carried h) -> "arbitrary".
            dimension_semantics=("parallel", "arbitrary"),
            vmem_limit_bytes=64 * 1024 * 1024,
        ),
        # TODO(synk): for large H, mark the resident weight/bias specs
        # pipeline_mode=pl.Buffered(1) to drop their double buffers (v7x 64 MiB VMEM).
    )(x_pad, wih_p, whh_p, bih_p, bhn_p)

    out = out_pad[:T, :B, :H]
    h_n = out[T - 1]              # last real timestep == final hidden state
    return out, h_n


def encoder_rnn_forward(tokens, embedding, w_ih, w_hh, b_ih, b_hh, *,
                        matmul_dtype=jnp.float32, hidden_matmul_dtype=jnp.float32,
                        max_tblk=64):
    """Forward pass of EncoderRNN.

    tokens   : (B, T) int32 token ids
    embedding: (V, H) f32
    returns  : output (B, T, H), hidden (1, B, H)  -- matches nn.GRU(batch_first=True)
    """
    # Gather the embedding TIME-MAJOR directly (transposing the small int32 token
    # matrix instead of the (B,T,H) activations).
    embedded_tbh = jnp.take(embedding, tokens.T, axis=0)       # (T, B, H)
    # Dropout(p=0.3) in eval mode is identity.
    # TODO(synk): training-mode dropout would use pltpu.prng_random_bits in-kernel.
    # TODO(synk): for realistic vocab sizes, fuse the embedding gather into the kernel
    #             via scalar-prefetched token ids + per-time-block DMA gather.
    out_tbh, h_last = gru_pallas(embedded_tbh, w_ih, w_hh, b_ih, b_hh,
                                 matmul_dtype=matmul_dtype,
                                 hidden_matmul_dtype=hidden_matmul_dtype,
                                 max_tblk=max_tblk)
    output = jnp.transpose(out_tbh, (1, 0, 2))                 # (B, T, H) batch-first
    hidden = h_last[None]                                      # (1, B, H)
    return output, hidden


def _reference_gru(embedded, w_ih, w_hh, b_ih, b_hh):
    """Pure-JAX reference implementing PyTorch GRU semantics (for verification)."""
    B, T, H = embedded.shape
    x_tbh = jnp.transpose(embedded, (1, 0, 2))

    def step(h, x_t):
        gi = x_t @ w_ih.T + b_ih
        gh = h @ w_hh.T + b_hh
        i_r, i_z, i_n = gi[:, :H], gi[:, H:2 * H], gi[:, 2 * H:]
        h_r, h_z, h_n = gh[:, :H], gh[:, H:2 * H], gh[:, 2 * H:]
        r = jax.nn.sigmoid(i_r + h_r)
        z = jax.nn.sigmoid(i_z + h_z)
        n = jnp.tanh(i_n + r * h_n)
        h_new = (1.0 - z) * n + z * h
        return h_new, h_new

    h0 = jnp.zeros((B, H), jnp.float32)
    h_last, outs = lax.scan(step, h0, x_tbh)
    return jnp.transpose(outs, (1, 0, 2)), h_last[None]


def _make_params(key, V, H):
    k_emb, k_wih, k_whh, k_bih, k_bhh, k_m1, k_m2 = jax.random.split(key, 7)
    embedding = jax.random.normal(k_emb, (V, H), jnp.float32)
    # Approximate nn.init.sparse_(sparsity=0.25): normal weights with ~25% zeros.
    w_ih = jax.random.normal(k_wih, (3 * H, H), jnp.float32) * 0.1
    w_ih = w_ih * (jax.random.uniform(k_m1, (3 * H, H)) > 0.25)
    w_hh = jax.random.normal(k_whh, (3 * H, H), jnp.float32) * 0.1
    w_hh = w_hh * (jax.random.uniform(k_m2, (3 * H, H)) > 0.25)
    # nn.init.uniform_ on biases -> U[0, 1)
    b_ih = jax.random.uniform(k_bih, (3 * H,), jnp.float32)
    b_hh = jax.random.uniform(k_bhh, (3 * H,), jnp.float32)
    return embedding, w_ih, w_hh, b_ih, b_hh


if __name__ == "__main__":
    V, H = 20, 32          # input_size (vocab), hidden_size
    key = jax.random.PRNGKey(0)
    k_params, k_tok1, k_tok2 = jax.random.split(key, 3)
    embedding, w_ih, w_hh, b_ih, b_hh = _make_params(k_params, V, H)

    # --- Test 1: B=2, T=8, f32 path (exact vs reference) -----------------------
    B, T = 2, 8
    tokens = jax.random.randint(k_tok1, (B, T), 0, V, dtype=jnp.int32)
    fwd_f32 = jax.jit(encoder_rnn_forward)
    output, hidden = fwd_f32(tokens, embedding, w_ih, w_hh, b_ih, b_hh)
    jax.block_until_ready((output, hidden))

    ref_out, ref_hid = _reference_gru(jnp.take(embedding, tokens, axis=0),
                                      w_ih, w_hh, b_ih, b_hh)
    assert output.shape == (B, T, H) and hidden.shape == (1, B, H)
    assert jnp.allclose(output, ref_out, atol=1e-4, rtol=1e-4)
    assert jnp.allclose(hidden, ref_hid, atol=1e-4, rtol=1e-4)

    # --- Test 2: non-divisible T and non-aligned B, small time blocks ----------
    # Exercises the cdiv/padded time grid (T=11, Tblk=4 -> Tp=12) and batch padding.
    B2, T2 = 3, 11
    tokens2 = jax.random.randint(k_tok2, (B2, T2), 0, V, dtype=jnp.int32)
    fwd_tail = jax.jit(functools.partial(encoder_rnn_forward, max_tblk=4))
    out2, hid2 = fwd_tail(tokens2, embedding, w_ih, w_hh, b_ih, b_hh)
    jax.block_until_ready((out2, hid2))

    ref_out2, ref_hid2 = _reference_gru(jnp.take(embedding, tokens2, axis=0),
                                        w_ih, w_hh, b_ih, b_hh)
    assert out2.shape == (B2, T2, H) and hid2.shape == (1, B2, H)
    assert jnp.allclose(out2, ref_out2, atol=1e-4, rtol=1e-4)
    assert jnp.allclose(hid2, ref_hid2, atol=1e-4, rtol=1e-4)

    # --- Test 3: bf16 input-side MXU operands, f32 hidden-side recurrence ------
    fwd_bf16 = jax.jit(functools.partial(encoder_rnn_forward,
                                         matmul_dtype=jnp.bfloat16,
                                         hidden_matmul_dtype=jnp.float32))
    out_bf16, hid_bf16 = fwd_bf16(tokens, embedding, w_ih, w_hh, b_ih, b_hh)
    jax.block_until_ready((out_bf16, hid_bf16))
    assert jnp.allclose(out_bf16, ref_out, atol=5e-2, rtol=5e-2)
    assert jnp.allclose(hid_bf16, ref_hid, atol=5e-2, rtol=5e-2)

    print("KERNEL_OK")
</pallas_src>

<mosaic_0001>
module attributes {stable_mosaic.version = 11 : i64} {
  func.func @_gru_kernel(%arg0: i32, %arg1: i32, %arg2: memref<8x8x128xf32, #tpu.memory_space<vmem>>, %arg3: memref<128x384xf32, #tpu.memory_space<vmem>>, %arg4: memref<128x384xf32, #tpu.memory_space<vmem>>, %arg5: memref<1x384xf32, #tpu.memory_space<vmem>>, %arg6: memref<1x128xf32, #tpu.memory_space<vmem>>, %arg7: memref<8x8x128xf32, #tpu.memory_space<vmem>>, %arg8: memref<8x8x384xf32, #tpu.memory_space<vmem>>, %arg9: memref<8x128xf32, #tpu.memory_space<vmem>>) attributes {dimension_semantics = [#tpu.dimension_semantics<parallel>, #tpu.dimension_semantics<arbitrary>], iteration_bounds = array<i64: 1, 1>, scalar_prefetch = 0 : i64, scratch_operands = 2 : i64, tpu.core_type = #tpu.core_type<tc>, window_params = [{transform_indices = @transform_0, window_bounds = array<i64: 8, 8, 128>}, {pipeline_mode = #tpu.pipeline_mode<synchronous>, transform_indices = @transform_1, window_bounds = array<i64: 128, 384>}, {pipeline_mode = #tpu.pipeline_mode<synchronous>, transform_indices = @transform_2, window_bounds = array<i64: 128, 384>}, {pipeline_mode = #tpu.pipeline_mode<synchronous>, transform_indices = @transform_3, window_bounds = array<i64: 1, 384>}, {pipeline_mode = #tpu.pipeline_mode<synchronous>, transform_indices = @transform_4, window_bounds = array<i64: 1, 128>}, {transform_indices = @transform_5, window_bounds = array<i64: 8, 8, 128>}]} {
    %c0_i32 = arith.constant 0 : i32
    %0 = arith.cmpi eq, %arg1, %c0_i32 : i32
    %1 = arith.extui %0 : i1 to i32
    %c0_i32_0 = arith.constant 0 : i32
    %2 = arith.cmpi ne, %1, %c0_i32_0 : i32
    scf.if %2 {
      %cst_75 = arith.constant 0.000000e+00 : f32
      %282 = vector.broadcast %cst_75 : f32 to vector<8x128xf32>
      %c0_76 = arith.constant 0 : index
      %c0_77 = arith.constant 0 : index
      %283 = vector.load %arg9[%c0_76, %c0_77] : memref<8x128xf32, #tpu.memory_space<vmem>>, vector<8x128xf32>
      tpu.vector_store %arg9[%c0_76, %c0_77], %282 {strides = array<i32>} : memref<8x128xf32, #tpu.memory_space<vmem>>, vector<8x128xf32>,
    } else {
    }
    %c0 = arith.constant 0 : index
    %c0_1 = arith.constant 0 : index
    %c0_2 = arith.constant 0 : index
    %3 = vector.load %arg2[%c0, %c0_1, %c0_2] : memref<8x8x128xf32, #tpu.memory_space<vmem>>, vector<8x8x128xf32>
    %4 = vector.shape_cast %3 : vector<8x8x128xf32> to vector<64x128xf32>
    %c0_3 = arith.constant 0 : index
    %c0_4 = arith.constant 0 : index
    %5 = vector.load %arg3[%c0_3, %c0_4] : memref<128x384xf32, #tpu.memory_space<vmem>>, vector<128x384xf32>
    %cst = arith.constant dense<0.000000e+00> : vector<64x384xf32>
    %6 = tpu.matmul %4, %5, %cst {dimension_numbers = #tpu.dot_dimension_numbers<[1], [0], [0], [1], [0, 0, 1, 1], [], []>} : vector<64x128xf32>, vector<128x384xf32>, vector<64x384xf32> -> vector<64x384xf32>
    %c0_5 = arith.constant 0 : index
    %c0_6 = arith.constant 0 : index
    %7 = vector.load %arg5[%c0_5, %c0_6] : memref<1x384xf32, #tpu.memory_space<vmem>>, vector<1x384xf32>
    %8 = vector.broadcast %7 : vector<1x384xf32> to vector<64x384xf32>
    %9 = arith.addf %6, %8 : vector<64x384xf32>
    %10 = vector.shape_cast %9 : vector<64x384xf32> to vector<8x8x384xf32>
    %c0_7 = arith.constant 0 : index
    %c0_8 = arith.constant 0 : index
    %c0_9 = arith.constant 0 : index
    %11 = vector.load %arg8[%c0_7, %c0_8, %c0_9] : memref<8x8x384xf32, #tpu.memory_space<vmem>>, vector<8x8x384xf32>
    tpu.vector_store %arg8[%c0_7, %c0_8, %c0_9], %10 {strides = array<i32>} : memref<8x8x384xf32, #tpu.memory_space<vmem>>, vector<8x8x384xf32>,
    %c0_10 = arith.constant 0 : index
    %c0_11 = arith.constant 0 : index
    %12 = vector.load %arg4[%c0_10, %c0_11] : memref<128x384xf32, #tpu.memory_space<vmem>>, vector<128x384xf32>
    %c0_12 = arith.constant 0 : index
    %c0_13 = arith.constant 0 : index
    %13 = vector.load %arg6[%c0_12, %c0_13] : memref<1x128xf32, #tpu.memory_space<vmem>>, vector<1x128xf32>
    %14 = vector.shape_cast %13 : vector<1x128xf32> to vector<1x128xf32>
    %15 = vector.broadcast %14 : vector<1x128xf32> to vector<8x128xf32>
    %c0_14 = arith.constant 0 : index
    %c0_15 = arith.constant 0 : index
    %16 = vector.load %arg9[%c0_14, %c0_15] : memref<8x128xf32, #tpu.memory_space<vmem>>, vector<8x128xf32>
    %c0_i32_16 = arith.constant 0 : i32
    %17 = arith.index_cast %c0_i32_16 : i32 to index
    %c0_17 = arith.constant 0 : index
    %c0_18 = arith.constant 0 : index
    %18 = vector.load %arg8[%17, %c0_17, %c0_18] : memref<8x8x384xf32, #tpu.memory_space<vmem>>, vector<1x8x384xf32>
    %19 = vector.shape_cast %18 : vector<1x8x384xf32> to vector<8x384xf32>
    %cst_19 = arith.constant dense<0.000000e+00> : vector<8x384xf32>
    %20 = tpu.matmul %16, %12, %cst_19 {dimension_numbers = #tpu.dot_dimension_numbers<[1], [0], [0], [1], [0, 0, 1, 1], [], []>} : vector<8x128xf32>, vector<128x384xf32>, vector<8x384xf32> -> vector<8x384xf32>
    %21 = vector.extract_strided_slice %19 {offsets = [0, 0], sizes = [8, 128], strides = [1, 1]} : vector<8x384xf32> to vector<8x128xf32>
    %22 = vector.extract_strided_slice %19 {offsets = [0, 128], sizes = [8, 128], strides = [1, 1]} : vector<8x384xf32> to vector<8x128xf32>
    %23 = vector.extract_strided_slice %19 {offsets = [0, 256], sizes = [8, 128], strides = [1, 1]} : vector<8x384xf32> to vector<8x128xf32>
    %24 = vector.extract_strided_slice %20 {offsets = [0, 0], sizes = [8, 128], strides = [1, 1]} : vector<8x384xf32> to vector<8x128xf32>
    %25 = vector.extract_strided_slice %20 {offsets = [0, 128], sizes = [8, 128], strides = [1, 1]} : vector<8x384xf32> to vector<8x128xf32>
    %26 = vector.extract_strided_slice %20 {offsets = [0, 256], sizes = [8, 128], strides = [1, 1]} : vector<8x384xf32> to vector<8x128xf32>
    %27 = arith.addf %21, %24 : vector<8x128xf32>
    %28 = arith.negf %27 : vector<8x128xf32>
    %29 = math.exp %28 : vector<8x128xf32>
    %cst_20 = arith.constant 1.000000e+00 : f32
    %30 = vector.broadcast %cst_20 : f32 to vector<8x128xf32>
    %31 = arith.addf %30, %29 : vector<8x128xf32>
    %32 = arith.divf %30, %31 : vector<8x128xf32>
    %33 = arith.addf %22, %25 : vector<8x128xf32>
    %34 = arith.negf %33 : vector<8x128xf32>
    %35 = math.exp %34 : vector<8x128xf32>
    %cst_21 = arith.constant 1.000000e+00 : f32
    %36 = vector.broadcast %cst_21 : f32 to vector<8x128xf32>
    %37 = arith.addf %36, %35 : vector<8x128xf32>
    %38 = arith.divf %36, %37 : vector<8x128xf32>
    %39 = arith.addf %26, %15 : vector<8x128xf32>
    %40 = arith.mulf %32, %39 : vector<8x128xf32>
    %41 = arith.addf %23, %40 : vector<8x128xf32>
    %42 = math.tanh %41 : vector<8x128xf32>
    %43 = arith.subf %16, %42 : vector<8x128xf32>
    %44 = arith.mulf %38, %43 : vector<8x128xf32>
    %45 = arith.addf %42, %44 : vector<8x128xf32>
    %46 = arith.index_cast %c0_i32_16 : i32 to index
    %c0_22 = arith.constant 0 : index
    %c0_23 = arith.constant 0 : index
    %47 = vector.load %arg7[%46, %c0_22, %c0_23] : memref<8x8x128xf32, #tpu.memory_space<vmem>>, vector<1x8x128xf32>
    %48 = vector.shape_cast %47 : vector<1x8x128xf32> to vector<8x128xf32>
    %49 = vector.shape_cast %45 : vector<8x128xf32> to vector<1x8x128xf32>
    tpu.vector_store %arg7[%46, %c0_22, %c0_23], %49 {strides = array<i32>} : memref<8x8x128xf32, #tpu.memory_space<vmem>>, vector<1x8x128xf32>,
    %c1_i32 = arith.constant 1 : i32
    %50 = arith.index_cast %c1_i32 : i32 to index
    %c0_24 = arith.constant 0 : index
    %c0_25 = arith.constant 0 : index
    %51 = vector.load %arg8[%50, %c0_24, %c0_25] : memref<8x8x384xf32, #tpu.memory_space<vmem>>, vector<1x8x384xf32>
    %52 = vector.shape_cast %51 : vector<1x8x384xf32> to vector<8x384xf32>
    %cst_26 = arith.constant dense<0.000000e+00> : vector<8x384xf32>
    %53 = tpu.matmul %45, %12, %cst_26 {dimension_numbers = #tpu.dot_dimension_numbers<[1], [0], [0], [1], [0, 0, 1, 1], [], []>} : vector<8x128xf32>, vector<128x384xf32>, vector<8x384xf32> -> vector<8x384xf32>
    %54 = vector.extract_strided_slice %52 {offsets = [0, 0], sizes = [8, 128], strides = [1, 1]} : vector<8x384xf32> to vector<8x128xf32>
    %55 = vector.extract_strided_slice %52 {offsets = [0, 128], sizes = [8, 128], strides = [1, 1]} : vector<8x384xf32> to vector<8x128xf32>
    %56 = vector.extract_strided_slice %52 {offsets = [0, 256], sizes = [8, 128], strides = [1, 1]} : vector<8x384xf32> to vector<8x128xf32>
    %57 = vector.extract_strided_slice %53 {offsets = [0, 0], sizes = [8, 128], strides = [1, 1]} : vector<8x384xf32> to vector<8x128xf32>
    %58 = vector.extract_strided_slice %53 {offsets = [0, 128], sizes = [8, 128], strides = [1, 1]} : vector<8x384xf32> to vector<8x128xf32>
    %59 = vector.extract_strided_slice %53 {offsets = [0, 256], sizes = [8, 128], strides = [1, 1]} : vector<8x384xf32> to vector<8x128xf32>
    %60 = arith.addf %54, %57 : vector<8x128xf32>
    %61 = arith.negf %60 : vector<8x128xf32>
    %62 = math.exp %61 : vector<8x128xf32>
    %cst_27 = arith.constant 1.000000e+00 : f32
    %63 = vector.broadcast %cst_27 : f32 to vector<8x128xf32>
    %64 = arith.addf %63, %62 : vector<8x128xf32>
    %65 = arith.divf %63, %64 : vector<8x128xf32>
    %66 = arith.addf %55, %58 : vector<8x128xf32>
    %67 = arith.negf %66 : vector<8x128xf32>
    %68 = math.exp %67 : vector<8x128xf32>
    %cst_28 = arith.constant 1.000000e+00 : f32
    %69 = vector.broadcast %cst_28 : f32 to vector<8x128xf32>
    %70 = arith.addf %69, %68 : vector<8x128xf32>
    %71 = arith.divf %69, %70 : vector<8x128xf32>
    %72 = arith.addf %59, %15 : vector<8x128xf32>
    %73 = arith.mulf %65, %72 : vector<8x128xf32>
    %74 = arith.addf %56, %73 : vector<8x128xf32>
    %75 = math.tanh %74 : vector<8x128xf32>
    %76 = arith.subf %45, %75 : vector<8x128xf32>
    %77 = arith.mulf %71, %76 : vector<8x128xf32>
    %78 = arith.addf %75, %77 : vector<8x128xf32>
    %79 = arith.index_cast %c1_i32 : i32 to index
    %c0_29 = arith.constant 0 : index
    %c0_30 = arith.constant 0 : index
    %80 = vector.load %arg7[%79, %c0_29, %c0_30] : memref<8x8x128xf32, #tpu.memory_space<vmem>>, vector<1x8x128xf32>
    %81 = vector.shape_cast %80 : vector<1x8x128xf32> to vector<8x128xf32>
    %82 = vector.shape_cast %78 : vector<8x128xf32> to vector<1x8x128xf32>
    tpu.vector_store %arg7[%79, %c0_29, %c0_30], %82 {strides = array<i32>} : memref<8x8x128xf32, #tpu.memory_space<vmem>>, vector<1x8x128xf32>,
    %c2_i32 = arith.constant 2 : i32
    %83 = arith.index_cast %c2_i32 : i32 to index
    %c0_31 = arith.constant 0 : index
    %c0_32 = arith.constant 0 : index
    %84 = vector.load %arg8[%83, %c0_31, %c0_32] : memref<8x8x384xf32, #tpu.memory_space<vmem>>, vector<1x8x384xf32>
    %85 = vector.shape_cast %84 : vector<1x8x384xf32> to vector<8x384xf32>
    %cst_33 = arith.constant dense<0.000000e+00> : vector<8x384xf32>
    %86 = tpu.matmul %78, %12, %cst_33 {dimension_numbers = #tpu.dot_dimension_numbers<[1], [0], [0], [1], [0, 0, 1, 1], [], []>} : vector<8x128xf32>, vector<128x384xf32>, vector<8x384xf32> -> vector<8x384xf32>
    %87 = vector.extract_strided_slice %85 {offsets = [0, 0], sizes = [8, 128], strides = [1, 1]} : vector<8x384xf32> to vector<8x128xf32>
    %88 = vector.extract_strided_slice %85 {offsets = [0, 128], sizes = [8, 128], strides = [1, 1]} : vector<8x384xf32> to vector<8x128xf32>
    %89 = vector.extract_strided_slice %85 {offsets = [0, 256], sizes = [8, 128], strides = [1, 1]} : vector<8x384xf32> to vector<8x128xf32>
    %90 = vector.extract_strided_slice %86 {offsets = [0, 0], sizes = [8, 128], strides = [1, 1]} : vector<8x384xf32> to vector<8x128xf32>
    %91 = vector.extract_strided_slice %86 {offsets = [0, 128], sizes = [8, 128], strides = [1, 1]} : vector<8x384xf32> to vector<8x128xf32>
    %92 = vector.extract_strided_slice %86 {offsets = [0, 256], sizes = [8, 128], strides = [1, 1]} : vector<8x384xf32> to vector<8x128xf32>
    %93 = arith.addf %87, %90 : vector<8x128xf32>
    %94 = arith.negf %93 : vector<8x128xf32>
    %95 = math.exp %94 : vector<8x128xf32>
    %cst_34 = arith.constant 1.000000e+00 : f32
    %96 = vector.broadcast %cst_34 : f32 to vector<8x128xf32>
    %97 = arith.addf %96, %95 : vector<8x128xf32>
    %98 = arith.divf %96, %97 : vector<8x128xf32>
    %99 = arith.addf %88, %91 : vector<8x128xf32>
    %100 = arith.negf %99 : vector<8x128xf32>
    %101 = math.exp %100 : vector<8x128xf32>
    %cst_35 = arith.constant 1.000000e+00 : f32
    %102 = vector.broadcast %cst_35 : f32 to vector<8x128xf32>
    %103 = arith.addf %102, %101 : vector<8x128xf32>
    %104 = arith.divf %102, %103 : vector<8x128xf32>
    %105 = arith.addf %92, %15 : vector<8x128xf32>
    %106 = arith.mulf %98, %105 : vector<8x128xf32>
    %107 = arith.addf %89, %106 : vector<8x128xf32>
    %108 = math.tanh %107 : vector<8x128xf32>
    %109 = arith.subf %78, %108 : vector<8x128xf32>
    %110 = arith.mulf %104, %109 : vector<8x128xf32>
    %111 = arith.addf %108, %110 : vector<8x128xf32>
    %112 = arith.index_cast %c2_i32 : i32 to index
    %c0_36 = arith.constant 0 : index
    %c0_37 = arith.constant 0 : index
    %113 = vector.load %arg7[%112, %c0_36, %c0_37] : memref<8x8x128xf32, #tpu.memory_space<vmem>>, vector<1x8x128xf32>
    %114 = vector.shape_cast %113 : vector<1x8x128xf32> to vector<8x128xf32>
    %115 = vector.shape_cast %111 : vector<8x128xf32> to vector<1x8x128xf32>
    tpu.vector_store %arg7[%112, %c0_36, %c0_37], %115 {strides = array<i32>} : memref<8x8x128xf32, #tpu.memory_space<vmem>>, vector<1x8x128xf32>,
    %c3_i32 = arith.constant 3 : i32
    %116 = arith.index_cast %c3_i32 : i32 to index
    %c0_38 = arith.constant 0 : index
    %c0_39 = arith.constant 0 : index
    %117 = vector.load %arg8[%116, %c0_38, %c0_39] : memref<8x8x384xf32, #tpu.memory_space<vmem>>, vector<1x8x384xf32>
    %118 = vector.shape_cast %117 : vector<1x8x384xf32> to vector<8x384xf32>
    %cst_40 = arith.constant dense<0.000000e+00> : vector<8x384xf32>
    %119 = tpu.matmul %111, %12, %cst_40 {dimension_numbers = #tpu.dot_dimension_numbers<[1], [0], [0], [1], [0, 0, 1, 1], [], []>} : vector<8x128xf32>, vector<128x384xf32>, vector<8x384xf32> -> vector<8x384xf32>
    %120 = vector.extract_strided_slice %118 {offsets = [0, 0], sizes = [8, 128], strides = [1, 1]} : vector<8x384xf32> to vector<8x128xf32>
    %121 = vector.extract_strided_slice %118 {offsets = [0, 128], sizes = [8, 128], strides = [1, 1]} : vector<8x384xf32> to vector<8x128xf32>
    %122 = vector.extract_strided_slice %118 {offsets = [0, 256], sizes = [8, 128], strides = [1, 1]} : vector<8x384xf32> to vector<8x128xf32>
    %123 = vector.extract_strided_slice %119 {offsets = [0, 0], sizes = [8, 128], strides = [1, 1]} : vector<8x384xf32> to vector<8x128xf32>
    %124 = vector.extract_strided_slice %119 {offsets = [0, 128], sizes = [8, 128], strides = [1, 1]} : vector<8x384xf32> to vector<8x128xf32>
    %125 = vector.extract_strided_slice %119 {offsets = [0, 256], sizes = [8, 128], strides = [1, 1]} : vector<8x384xf32> to vector<8x128xf32>
    %126 = arith.addf %120, %123 : vector<8x128xf32>
    %127 = arith.negf %126 : vector<8x128xf32>
    %128 = math.exp %127 : vector<8x128xf32>
    %cst_41 = arith.constant 1.000000e+00 : f32
    %129 = vector.broadcast %cst_41 : f32 to vector<8x128xf32>
    %130 = arith.addf %129, %128 : vector<8x128xf32>
    %131 = arith.divf %129, %130 : vector<8x128xf32>
    %132 = arith.addf %121, %124 : vector<8x128xf32>
    %133 = arith.negf %132 : vector<8x128xf32>
    %134 = math.exp %133 : vector<8x128xf32>
    %cst_42 = arith.constant 1.000000e+00 : f32
    %135 = vector.broadcast %cst_42 : f32 to vector<8x128xf32>
    %136 = arith.addf %135, %134 : vector<8x128xf32>
    %137 = arith.divf %135, %136 : vector<8x128xf32>
    %138 = arith.addf %125, %15 : vector<8x128xf32>
    %139 = arith.mulf %131, %138 : vector<8x128xf32>
    %140 = arith.addf %122, %139 : vector<8x128xf32>
    %141 = math.tanh %140 : vector<8x128xf32>
    %142 = arith.subf %111, %141 : vector<8x128xf32>
    %143 = arith.mulf %137, %142 : vector<8x128xf32>
    %144 = arith.addf %141, %143 : vector<8x128xf32>
    %145 = arith.index_cast %c3_i32 : i32 to index
    %c0_43 = arith.constant 0 : index
    %c0_44 = arith.constant 0 : index
    %146 = vector.load %arg7[%145, %c0_43, %c0_44] : memref<8x8x128xf32, #tpu.memory_space<vmem>>, vector<1x8x128xf32>
    %147 = vector.shape_cast %146 : vector<1x8x128xf32> to vector<8x128xf32>
    %148 = vector.shape_cast %144 : vector<8x128xf32> to vector<1x8x128xf32>
    tpu.vector_store %arg7[%145, %c0_43, %c0_44], %148 {strides = array<i32>} : memref<8x8x128xf32, #tpu.memory_space<vmem>>, vector<1x8x128xf32>,
    %c4_i32 = arith.constant 4 : i32
    %149 = arith.index_cast %c4_i32 : i32 to index
    %c0_45 = arith.constant 0 : index
    %c0_46 = arith.constant 0 : index
    %150 = vector.load %arg8[%149, %c0_45, %c0_46] : memref<8x8x384xf32, #tpu.memory_space<vmem>>, vector<1x8x384xf32>
    %151 = vector.shape_cast %150 : vector<1x8x384xf32> to vector<8x384xf32>
    %cst_47 = arith.constant dense<0.000000e+00> : vector<8x384xf32>
    %152 = tpu.matmul %144, %12, %cst_47 {dimension_numbers = #tpu.dot_dimension_numbers<[1], [0], [0], [1], [0, 0, 1, 1], [], []>} : vector<8x128xf32>, vector<128x384xf32>, vector<8x384xf32> -> vector<8x384xf32>
    %153 = vector.extract_strided_slice %151 {offsets = [0, 0], sizes = [8, 128], strides = [1, 1]} : vector<8x384xf32> to vector<8x128xf32>
    %154 = vector.extract_strided_slice %151 {offsets = [0, 128], sizes = [8, 128], strides = [1, 1]} : vector<8x384xf32> to vector<8x128xf32>
    %155 = vector.extract_strided_slice %151 {offsets = [0, 256], sizes = [8, 128], strides = [1, 1]} : vector<8x384xf32> to vector<8x128xf32>
    %156 = vector.extract_strided_slice %152 {offsets = [0, 0], sizes = [8, 128], strides = [1, 1]} : vector<8x384xf32> to vector<8x128xf32>
    %157 = vector.extract_strided_slice %152 {offsets = [0, 128], sizes = [8, 128], strides = [1, 1]} : vector<8x384xf32> to vector<8x128xf32>
    %158 = vector.extract_strided_slice %152 {offsets = [0, 256], sizes = [8, 128], strides = [1, 1]} : vector<8x384xf32> to vector<8x128xf32>
    %159 = arith.addf %153, %156 : vector<8x128xf32>
    %160 = arith.negf %159 : vector<8x128xf32>
    %161 = math.exp %160 : vector<8x128xf32>
    %cst_48 = arith.constant 1.000000e+00 : f32
    %162 = vector.broadcast %cst_48 : f32 to vector<8x128xf32>
    %163 = arith.addf %162, %161 : vector<8x128xf32>
    %164 = arith.divf %162, %163 : vector<8x128xf32>
    %165 = arith.addf %154, %157 : vector<8x128xf32>
    %166 = arith.negf %165 : vector<8x128xf32>
    %167 = math.exp %166 : vector<8x128xf32>
    %cst_49 = arith.constant 1.000000e+00 : f32
    %168 = vector.broadcast %cst_49 : f32 to vector<8x128xf32>
    %169 = arith.addf %168, %167 : vector<8x128xf32>
    %170 = arith.divf %168, %169 : vector<8x128xf32>
    %171 = arith.addf %158, %15 : vector<8x128xf32>
    %172 = arith.mulf %164, %171 : vector<8x128xf32>
    %173 = arith.addf %155, %172 : vector<8x128xf32>
    %174 = math.tanh %173 : vector<8x128xf32>
    %175 = arith.subf %144, %174 : vector<8x128xf32>
    %176 = arith.mulf %170, %175 : vector<8x128xf32>
    %177 = arith.addf %174, %176 : vector<8x128xf32>
    %178 = arith.index_cast %c4_i32 : i32 to index
    %c0_50 = arith.constant 0 : index
    %c0_51 = arith.constant 0 : index
    %179 = vector.load %arg7[%178, %c0_50, %c0_51] : memref<8x8x128xf32, #tpu.memory_space<vmem>>, vector<1x8x128xf32>
    %180 = vector.shape_cast %179 : vector<1x8x128xf32> to vector<8x128xf32>
    %181 = vector.shape_cast %177 : vector<8x128xf32> to vector<1x8x128xf32>
    tpu.vector_store %arg7[%178, %c0_50, %c0_51], %181 {strides = array<i32>} : memref<8x8x128xf32, #tpu.memory_space<vmem>>, vector<1x8x128xf32>,
    %c5_i32 = arith.constant 5 : i32
    %182 = arith.index_cast %c5_i32 : i32 to index
    %c0_52 = arith.constant 0 : index
    %c0_53 = arith.constant 0 : index
    %183 = vector.load %arg8[%182, %c0_52, %c0_53] : memref<8x8x384xf32, #tpu.memory_space<vmem>>, vector<1x8x384xf32>
    %184 = vector.shape_cast %183 : vector<1x8x384xf32> to vector<8x384xf32>
    %cst_54 = arith.constant dense<0.000000e+00> : vector<8x384xf32>
    %185 = tpu.matmul %177, %12, %cst_54 {dimension_numbers = #tpu.dot_dimension_numbers<[1], [0], [0], [1], [0, 0, 1, 1], [], []>} : vector<8x128xf32>, vector<128x384xf32>, vector<8x384xf32> -> vector<8x384xf32>
    %186 = vector.extract_strided_slice %184 {offsets = [0, 0], sizes = [8, 128], strides = [1, 1]} : vector<8x384xf32> to vector<8x128xf32>
    %187 = vector.extract_strided_slice %184 {offsets = [0, 128], sizes = [8, 128], strides = [1, 1]} : vector<8x384xf32> to vector<8x128xf32>
    %188 = vector.extract_strided_slice %184 {offsets = [0, 256], sizes = [8, 128], strides = [1, 1]} : vector<8x384xf32> to vector<8x128xf32>
    %189 = vector.extract_strided_slice %185 {offsets = [0, 0], sizes = [8, 128], strides = [1, 1]} : vector<8x384xf32> to vector<8x128xf32>
    %190 = vector.extract_strided_slice %185 {offsets = [0, 128], sizes = [8, 128], strides = [1, 1]} : vector<8x384xf32> to vector<8x128xf32>
    %191 = vector.extract_strided_slice %185 {offsets = [0, 256], sizes = [8, 128], strides = [1, 1]} : vector<8x384xf32> to vector<8x128xf32>
    %192 = arith.addf %186, %189 : vector<8x128xf32>
    %193 = arith.negf %192 : vector<8x128xf32>
    %194 = math.exp %193 : vector<8x128xf32>
    %cst_55 = arith.constant 1.000000e+00 : f32
    %195 = vector.broadcast %cst_55 : f32 to vector<8x128xf32>
    %196 = arith.addf %195, %194 : vector<8x128xf32>
    %197 = arith.divf %195, %196 : vector<8x128xf32>
    %198 = arith.addf %187, %190 : vector<8x128xf32>
    %199 = arith.negf %198 : vector<8x128xf32>
    %200 = math.exp %199 : vector<8x128xf32>
    %cst_56 = arith.constant 1.000000e+00 : f32
    %201 = vector.broadcast %cst_56 : f32 to vector<8x128xf32>
    %202 = arith.addf %201, %200 : vector<8x128xf32>
    %203 = arith.divf %201, %202 : vector<8x128xf32>
    %204 = arith.addf %191, %15 : vector<8x128xf32>
    %205 = arith.mulf %197, %204 : vector<8x128xf32>
    %206 = arith.addf %188, %205 : vector<8x128xf32>
    %207 = math.tanh %206 : vector<8x128xf32>
    %208 = arith.subf %177, %207 : vector<8x128xf32>
    %209 = arith.mulf %203, %208 : vector<8x128xf32>
    %210 = arith.addf %207, %209 : vector<8x128xf32>
    %211 = arith.index_cast %c5_i32 : i32 to index
    %c0_57 = arith.constant 0 : index
    %c0_58 = arith.constant 0 : index
    %212 = vector.load %arg7[%211, %c0_57, %c0_58] : memref<8x8x128xf32, #tpu.memory_space<vmem>>, vector<1x8x128xf32>
    %213 = vector.shape_cast %212 : vector<1x8x128xf32> to vector<8x128xf32>
    %214 = vector.shape_cast %210 : vector<8x128xf32> to vector<1x8x128xf32>
    tpu.vector_store %arg7[%211, %c0_57, %c0_58], %214 {strides = array<i32>} : memref<8x8x128xf32, #tpu.memory_space<vmem>>, vector<1x8x128xf32>,
    %c6_i32 = arith.constant 6 : i32
    %215 = arith.index_cast %c6_i32 : i32 to index
    %c0_59 = arith.constant 0 : index
    %c0_60 = arith.constant 0 : index
    %216 = vector.load %arg8[%215, %c0_59, %c0_60] : memref<8x8x384xf32, #tpu.memory_space<vmem>>, vector<1x8x384xf32>
    %217 = vector.shape_cast %216 : vector<1x8x384xf32> to vector<8x384xf32>
    %cst_61 = arith.constant dense<0.000000e+00> : vector<8x384xf32>
    %218 = tpu.matmul %210, %12, %cst_61 {dimension_numbers = #tpu.dot_dimension_numbers<[1], [0], [0], [1], [0, 0, 1, 1], [], []>} : vector<8x128xf32>, vector<128x384xf32>, vector<8x384xf32> -> vector<8x384xf32>
    %219 = vector.extract_strided_slice %217 {offsets = [0, 0], sizes = [8, 128], strides = [1, 1]} : vector<8x384xf32> to vector<8x128xf32>
    %220 = vector.extract_strided_slice %217 {offsets = [0, 128], sizes = [8, 128], strides = [1, 1]} : vector<8x384xf32> to vector<8x128xf32>
    %221 = vector.extract_strided_slice %217 {offsets = [0, 256], sizes = [8, 128], strides = [1, 1]} : vector<8x384xf32> to vector<8x128xf32>
    %222 = vector.extract_strided_slice %218 {offsets = [0, 0], sizes = [8, 128], strides = [1, 1]} : vector<8x384xf32> to vector<8x128xf32>
    %223 = vector.extract_strided_slice %218 {offsets = [0, 128], sizes = [8, 128], strides = [1, 1]} : vector<8x384xf32> to vector<8x128xf32>
    %224 = vector.extract_strided_slice %218 {offsets = [0, 256], sizes = [8, 128], strides = [1, 1]} : vector<8x384xf32> to vector<8x128xf32>
    %225 = arith.addf %219, %222 : vector<8x128xf32>
    %226 = arith.negf %225 : vector<8x128xf32>
    %227 = math.exp %226 : vector<8x128xf32>
    %cst_62 = arith.constant 1.000000e+00 : f32
    %228 = vector.broadcast %cst_62 : f32 to vector<8x128xf32>
    %229 = arith.addf %228, %227 : vector<8x128xf32>
    %230 = arith.divf %228, %229 : vector<8x128xf32>
    %231 = arith.addf %220, %223 : vector<8x128xf32>
    %232 = arith.negf %231 : vector<8x128xf32>
    %233 = math.exp %232 : vector<8x128xf32>
    %cst_63 = arith.constant 1.000000e+00 : f32
    %234 = vector.broadcast %cst_63 : f32 to vector<8x128xf32>
    %235 = arith.addf %234, %233 : vector<8x128xf32>
    %236 = arith.divf %234, %235 : vector<8x128xf32>
    %237 = arith.addf %224, %15 : vector<8x128xf32>
    %238 = arith.mulf %230, %237 : vector<8x128xf32>
    %239 = arith.addf %221, %238 : vector<8x128xf32>
    %240 = math.tanh %239 : vector<8x128xf32>
    %241 = arith.subf %210, %240 : vector<8x128xf32>
    %242 = arith.mulf %236, %241 : vector<8x128xf32>
    %243 = arith.addf %240, %242 : vector<8x128xf32>
    %244 = arith.index_cast %c6_i32 : i32 to index
    %c0_64 = arith.constant 0 : index
    %c0_65 = arith.constant 0 : index
    %245 = vector.load %arg7[%244, %c0_64, %c0_65] : memref<8x8x128xf32, #tpu.memory_space<vmem>>, vector<1x8x128xf32>
    %246 = vector.shape_cast %245 : vector<1x8x128xf32> to vector<8x128xf32>
    %247 = vector.shape_cast %243 : vector<8x128xf32> to vector<1x8x128xf32>
    tpu.vector_store %arg7[%244, %c0_64, %c0_65], %247 {strides = array<i32>} : memref<8x8x128xf32, #tpu.memory_space<vmem>>, vector<1x8x128xf32>,
    %c7_i32 = arith.constant 7 : i32
    %248 = arith.index_cast %c7_i32 : i32 to index
    %c0_66 = arith.constant 0 : index
    %c0_67 = arith.constant 0 : index
    %249 = vector.load %arg8[%248, %c0_66, %c0_67] : memref<8x8x384xf32, #tpu.memory_space<vmem>>, vector<1x8x384xf32>
    %250 = vector.shape_cast %249 : vector<1x8x384xf32> to vector<8x384xf32>
    %cst_68 = arith.constant dense<0.000000e+00> : vector<8x384xf32>
    %251 = tpu.matmul %243, %12, %cst_68 {dimension_numbers = #tpu.dot_dimension_numbers<[1], [0], [0], [1], [0, 0, 1, 1], [], []>} : vector<8x128xf32>, vector<128x384xf32>, vector<8x384xf32> -> vector<8x384xf32>
    %252 = vector.extract_strided_slice %250 {offsets = [0, 0], sizes = [8, 128], strides = [1, 1]} : vector<8x384xf32> to vector<8x128xf32>
    %253 = vector.extract_strided_slice %250 {offsets = [0, 128], sizes = [8, 128], strides = [1, 1]} : vector<8x384xf32> to vector<8x128xf32>
    %254 = vector.extract_strided_slice %250 {offsets = [0, 256], sizes = [8, 128], strides = [1, 1]} : vector<8x384xf32> to vector<8x128xf32>
    %255 = vector.extract_strided_slice %251 {offsets = [0, 0], sizes = [8, 128], strides = [1, 1]} : vector<8x384xf32> to vector<8x128xf32>
    %256 = vector.extract_strided_slice %251 {offsets = [0, 128], sizes = [8, 128], strides = [1, 1]} : vector<8x384xf32> to vector<8x128xf32>
    %257 = vector.extract_strided_slice %251 {offsets = [0, 256], sizes = [8, 128], strides = [1, 1]} : vector<8x384xf32> to vector<8x128xf32>
    %258 = arith.addf %252, %255 : vector<8x128xf32>
    %259 = arith.negf %258 : vector<8x128xf32>
    %260 = math.exp %259 : vector<8x128xf32>
    %cst_69 = arith.constant 1.000000e+00 : f32
    %261 = vector.broadcast %cst_69 : f32 to vector<8x128xf32>
    %262 = arith.addf %261, %260 : vector<8x128xf32>
    %263 = arith.divf %261, %262 : vector<8x128xf32>
    %264 = arith.addf %253, %256 : vector<8x128xf32>
    %265 = arith.negf %264 : vector<8x128xf32>
    %266 = math.exp %265 : vector<8x128xf32>
    %cst_70 = arith.constant 1.000000e+00 : f32
    %267 = vector.broadcast %cst_70 : f32 to vector<8x128xf32>
    %268 = arith.addf %267, %266 : vector<8x128xf32>
    %269 = arith.divf %267, %268 : vector<8x128xf32>
    %270 = arith.addf %257, %15 : vector<8x128xf32>
    %271 = arith.mulf %263, %270 : vector<8x128xf32>
    %272 = arith.addf %254, %271 : vector<8x128xf32>
    %273 = math.tanh %272 : vector<8x128xf32>
    %274 = arith.subf %243, %273 : vector<8x128xf32>
    %275 = arith.mulf %269, %274 : vector<8x128xf32>
    %276 = arith.addf %273, %275 : vector<8x128xf32>
    %277 = arith.index_cast %c7_i32 : i32 to index
    %c0_71 = arith.constant 0 : index
    %c0_72 = arith.constant 0 : index
    %278 = vector.load %arg7[%277, %c0_71, %c0_72] : memref<8x8x128xf32, #tpu.memory_space<vmem>>, vector<1x8x128xf32>
    %279 = vector.shape_cast %278 : vector<1x8x128xf32> to vector<8x128xf32>
    %280 = vector.shape_cast %276 : vector<8x128xf32> to vector<1x8x128xf32>
    tpu.vector_store %arg7[%277, %c0_71, %c0_72], %280 {strides = array<i32>} : memref<8x8x128xf32, #tpu.memory_space<vmem>>, vector<1x8x128xf32>,
    %c8_i32 = arith.constant 8 : i32
    %c0_73 = arith.constant 0 : index
    %c0_74 = arith.constant 0 : index
    %281 = vector.load %arg9[%c0_73, %c0_74] : memref<8x128xf32, #tpu.memory_space<vmem>>, vector<8x128xf32>
    tpu.vector_store %arg9[%c0_73, %c0_74], %276 {strides = array<i32>} : memref<8x128xf32, #tpu.memory_space<vmem>>, vector<8x128xf32>,
    return
  }
  func.func @transform_0(%arg0: i32, %arg1: i32) -> (i32, i32, i32) {
    %c0_i32 = arith.constant 0 : i32
    %c0_i32_0 = arith.constant 0 : i32
    return %arg1, %arg0, %c0_i32 : i32, i32, i32
  }
  func.func @transform_1(%arg0: i32, %arg1: i32) -> (i32, i32) {
    %c0_i32 = arith.constant 0 : i32
    %c0_i32_0 = arith.constant 0 : i32
    %c0_i32_1 = arith.constant 0 : i32
    return %c0_i32, %c0_i32_0 : i32, i32
  }
  func.func @transform_2(%arg0: i32, %arg1: i32) -> (i32, i32) {
    %c0_i32 = arith.constant 0 : i32
    %c0_i32_0 = arith.constant 0 : i32
    %c0_i32_1 = arith.constant 0 : i32
    return %c0_i32, %c0_i32_0 : i32, i32
  }
  func.func @transform_3(%arg0: i32, %arg1: i32) -> (i32, i32) {
    %c0_i32 = arith.constant 0 : i32
    %c0_i32_0 = arith.constant 0 : i32
    %c0_i32_1 = arith.constant 0 : i32
    return %c0_i32, %c0_i32_0 : i32, i32
  }
  func.func @transform_4(%arg0: i32, %arg1: i32) -> (i32, i32) {
    %c0_i32 = arith.constant 0 : i32
    %c0_i32_0 = arith.constant 0 : i32
    %c0_i32_1 = arith.constant 0 : i32
    return %c0_i32, %c0_i32_0 : i32, i32
  }
  func.func @transform_5(%arg0: i32, %arg1: i32) -> (i32, i32, i32) {
    %c0_i32 = arith.constant 0 : i32
    %c0_i32_0 = arith.constant 0 : i32
    return %arg1, %arg0, %c0_i32 : i32, i32, i32
  }
}

</mosaic_0001>

<bundles_post_ra>
// kernel: encoder_rnn_forward.1
= control target key start
LH: loop header
LB: loop body
LE: loop exit
PB: predicated region body
PF: predicated region fallthrough
CT: control target
= control target key end

     0   :  { %v3774_v3 = vmov 0.0   ;;  %vm2383_vm0 = vmmov 0   ;;  %s3768_s1 = inlined_call_operand.vmem [shape: f32[128,384], index: 1, kind: input, shape index: {}]   ;;  %s3769_s0 = inlined_call_operand.vmem [shape: f32[8,8,128], index: 0, kind: input, shape index: {}]   ;;  %s3770_s2 = inlined_call_operand.vmem [shape: f32[128,384], index: 2, kind: input, shape index: {}]   ;;  %s3771_s3 = inlined_call_operand.vmem [shape: f32[1,384], index: 3, kind: input, shape index: {}]   ;;  %s3772_s4 = inlined_call_operand.vmem [shape: f32[1,128], index: 4, kind: input, shape index: {}]   ;;  %s3773_s5 = inlined_call_operand.vmem [shape: f32[8,8,128], index: 5, kind: output, shape index: {}]  }
   0x1   :  { %v79_v0 = vld [vmem:[%s3768_s1 + $0x170] sm:$0xff]  ;;  %v78_v1 = vld [vmem:[%s3768_s1 + $0x168] sm:$0xff]  ;;  %v76_v2 = vld [vmem:[%s3768_s1 + $0x158] sm:$0xff]  ;;  %162 = vmatprep.mubr.f32.mxu0 %v3774_v3 }
   0x2   :  { %98 = vmatprep.subr.mxu0 %v79_v0  ;;  %v75_v4 = vld [vmem:[%s3768_s1 + $0x150] sm:$0xff]  ;;  %v73_v5 = vld [vmem:[%s3768_s1 + $0x140] sm:$0xff]  ;;  %v72_v6 = vld [vmem:[%s3768_s1 + $0x138] sm:$0xff] }
   0x3   :  { %99 = vmatpush1.msra.mxu0 %v78_v1  ;;  %v70_v7 = vld [vmem:[%s3768_s1 + $0x128] sm:$0xff]  ;;  %v69_v8 = vld [vmem:[%s3768_s1 + $0x120] sm:$0xff]  ;;  %v67_v9 = vld [vmem:[%s3768_s1 + $0x110] sm:$0xff] }
   0x4   :  { %100 = vmatprep.subr.mxu0 %v76_v2  ;;  %v66_v10 = vld [vmem:[%s3768_s1 + $0x108] sm:$0xff]  ;;  %v64_v11 = vld [vmem:[%s3768_s1 + $0xf8] sm:$0xff]  ;;  %v63_v12 = vld [vmem:[%s3768_s1 + $0xf0] sm:$0xff] }
   0x5   :  { %101 = vmatpush1.msra.mxu0 %v75_v4  ;;  %v61_v13 = vld [vmem:[%s3768_s1 + $0xe0] sm:$0xff]  ;;  %v80_v14 = vld [vmem:[%s3768_s1 + $0x178] sm:$0xff]  ;;  %v58_v17 = vld [vmem:[%s3768_s1 + $0xc8] sm:$0xff] }
   0x6   :  { %102 = vmatprep.subr.mxu0 %v73_v5  ;;  %v60_v15 = vld [vmem:[%s3768_s1 + $0xd8] sm:$0xff]  ;;  %1927 = vmatprep.subr.mxu1 %v80_v14  ;;  %v77_v16 = vld [vmem:[%s3768_s1 + $0x160] sm:$0xff]  ;;  %v74_v18 = vld [vmem:[%s3768_s1 + $0x148] sm:$0xff] }
   0x7   :  { %103 = vmatpush1.msra.mxu0 %v72_v6  ;;  %1928 = vmatpush3.msra.mxu1 %v80_v14  ;;  %v57_v19 = vld [vmem:[%s3768_s1 + $0xc0] sm:$0xff]  ;;  %v55_v20 = vld [vmem:[%s3768_s1 + $0xb0] sm:$0xff]  ;;  %v54_v22 = vld [vmem:[%s3768_s1 + $0xa8] sm:$0xff] }
   0x8   :  { %104 = vmatprep.subr.mxu0 %v70_v7  ;;  %1929 = vmatprep.subr.mxu1 %v77_v16  ;;  %v71_v21 = vld [vmem:[%s3768_s1 + $0x130] sm:$0xff]  ;;  %v52_v23 = vld [vmem:[%s3768_s1 + $0x98] sm:$0xff]  ;;  %v49_v26 = vld [vmem:[%s3768_s1 + $0x80] sm:$0xff] }
   0x9   :  { %105 = vmatpush1.msra.mxu0 %v69_v8  ;;  %1930 = vmatpush3.msra.mxu1 %v77_v16  ;;  %v68_v24 = vld [vmem:[%s3768_s1 + $0x118] sm:$0xff]  ;;  %v51_v25 = vld [vmem:[%s3768_s1 + $0x90] sm:$0xff]  ;;  %v65_v27 = vld [vmem:[%s3768_s1 + $0x100] sm:$0xff] }
   0xa   :  { %106 = vmatprep.subr.mxu0 %v67_v9  ;;  %1931 = vmatprep.subr.mxu1 %v74_v18  ;;  %v48_v28 = vld [vmem:[%s3768_s1 + $0x78] sm:$0xff]  ;;  %v46_v29 = vld [vmem:[%s3768_s1 + $0x68] sm:$0xff]  ;;  %v45_v31 = vld [vmem:[%s3768_s1 + $0x60] sm:$0xff] }
   0xb   :  { %107 = vmatpush1.msra.mxu0 %v66_v10  ;;  %1932 = vmatpush3.msra.mxu1 %v74_v18  ;;  %v62_v30 = vld [vmem:[%s3768_s1 + $0xe8] sm:$0xff]  ;;  %v43_v32 = vld [vmem:[%s3768_s1 + $0x50] sm:$0xff]  ;;  %v40_v35 = vld [vmem:[%s3768_s1 + $0x38] sm:$0xff] }
   0xc   :  { %108 = vmatprep.subr.mxu0 %v64_v11  ;;  %1933 = vmatprep.subr.mxu1 %v71_v21  ;;  %v59_v33 = vld [vmem:[%s3768_s1 + $0xd0] sm:$0xff]  ;;  %v42_v34 = vld [vmem:[%s3768_s1 + $0x48] sm:$0xff]  ;;  %v56_v36 = vld [vmem:[%s3768_s1 + $0xb8] sm:$0xff] }
   0xd   :  { %109 = vmatpush1.msra.mxu0 %v63_v12  ;;  %1934 = vmatpush3.msra.mxu1 %v71_v21  ;;  %v39_v37 = vld [vmem:[%s3768_s1 + $0x30] sm:$0xff]  ;;  %v37_v38 = vld [vmem:[%s3768_s1 + $0x20] sm:$0xff]  ;;  %v36_v40 = vld [vmem:[%s3768_s1 + $0x18] sm:$0xff] }
   0xe   :  { %110 = vmatprep.subr.mxu0 %v61_v13  ;;  %1935 = vmatprep.subr.mxu1 %v68_v24  ;;  %v53_v39 = vld [vmem:[%s3768_s1 + $0xa0] sm:$0xff]  ;;  %v34_v41 = vld [vmem:[%s3768_s1 + $0x8] sm:$0xff]  ;;  %v2552_v45 = vld [vmem:[%s3770_s2 + $0x170] sm:$0xff] }
   0xf   :  { %111 = vmatpush1.msra.mxu0 %v60_v15  ;;  %1936 = vmatpush3.msra.mxu1 %v68_v24  ;;  %v50_v42 = vld [vmem:[%s3768_s1 + $0x88] sm:$0xff]  ;;  %v33_v43 = vld [vmem:[%s3768_s1] sm:$0xff]  ;;  %3793 = vst [vmem:[#allocation4_spill] sm:$0xff] %v2552_v45  ;;  %v2562_v47 = vld [vmem:[%s3770_s2 + $0x158] sm:$0xff] }
  0x10   :  { %112 = vmatprep.subr.mxu0 %v58_v17  ;;  %1937 = vmatprep.subr.mxu1 %v65_v27  ;;  %v2547_v44 = vld [vmem:[%s3769_s0] sm:$0xff]  ;;  %v2557_v46 = vld [vmem:[%s3770_s2 + $0x168] sm:$0xff]  ;;  %v47_v48 = vld [vmem:[%s3768_s1 + $0x70] sm:$0xff] }
  0x11   :  { %113 = vmatpush1.msra.mxu0 %v57_v19  ;;  %1938 = vmatpush3.msra.mxu1 %v65_v27  ;;  %v2572_v49 = vld [vmem:[%s3770_s2 + $0x150] sm:$0xff]  ;;  %v2579_v50 = vld [vmem:[%s3769_s0 + $0x8] sm:$0xff]  ;;  %v2584_v51 = vld [vmem:[%s3770_s2 + $0x140] sm:$0xff] }
  0x12   :  { %114 = vmatprep.subr.mxu0 %v55_v20  ;;  %1939 = vmatprep.subr.mxu1 %v62_v30  ;;  %v2590_v52 = vld [vmem:[%s3770_s2 + $0x138] sm:$0xff]  ;;  %v2596_v53 = vld [vmem:[%s3770_s2 + $0x128] sm:$0xff]  ;;  %v2606_v55 = vld [vmem:[%s3770_s2 + $0x120] sm:$0xff] }
  0x13   :  { %115 = vmatpush1.msra.mxu0 %v54_v22  ;;  %1940 = vmatpush3.msra.mxu1 %v62_v30  ;;  %v44_v54 = vld [vmem:[%s3768_s1 + $0x58] sm:$0xff]  ;;  %v2613_v56 = vld [vmem:[%s3769_s0 + $0x10] sm:$0xff]  ;;  %v2624_v58 = vld [vmem:[%s3770_s2 + $0x108] sm:$0xff] }
  0x14   :  { %116 = vmatprep.subr.mxu0 %v52_v23  ;;  %1941 = vmatprep.subr.mxu1 %v59_v33  ;;  %v2618_v57 = vld [vmem:[%s3770_s2 + $0x110] sm:$0xff]  ;;  %v2630_v59 = vld [vmem:[%s3770_s2 + $0xf8] sm:$0xff]  ;;  %v41_v60 = vld [vmem:[%s3768_s1 + $0x40] sm:$0xff] }
  0x15   :  { %117 = vmatpush1.msra.mxu0 %v51_v25  ;;  %1942 = vmatpush3.msra.mxu1 %v59_v33  ;;  %v2640_v61 = vld [vmem:[%s3770_s2 + $0xf0] sm:$0xff]  ;;  %v2647_v62 = vld [vmem:[%s3769_s0 + $0x18] sm:$0xff]  ;;  %v2652_v63 = vld [vmem:[%s3770_s2 + $0xe0] sm:$0xff] }
  0x16   :  { %118 = vmatprep.subr.mxu0 %v49_v26  ;;  %1943 = vmatprep.subr.mxu1 %v56_v36  ;;  %v2658_v0 = vld [vmem:[%s3770_s2 + $0xd8] sm:$0xff]  ;;  %v2664_v1 = vld [vmem:[%s3770_s2 + $0xc8] sm:$0xff]  ;;  %v2674_v4 = vld [vmem:[%s3770_s2 + $0xc0] sm:$0xff] }
  0x17   :  { %119 = vmatpush1.msra.mxu0 %v48_v28  ;;  %1944 = vmatpush3.msra.mxu1 %v56_v36  ;;  %v38_v2 = vld [vmem:[%s3768_s1 + $0x28] sm:$0xff]  ;;  %v2681_v5 = vld [vmem:[%s3769_s0 + $0x20] sm:$0xff]  ;;  %v2686_v6 = vld [vmem:[%s3770_s2 + $0xb0] sm:$0xff] }
  0x18   :  { %120 = vmatprep.subr.mxu0 %v46_v29  ;;  %1945 = vmatprep.subr.mxu1 %v53_v39  ;;  %v2692_v7 = vld [vmem:[%s3770_s2 + $0xa8] sm:$0xff]  ;;  %v2698_v8 = vld [vmem:[%s3770_s2 + $0x98] sm:$0xff]  ;;  %v35_v9 = vld [vmem:[%s3768_s1 + $0x10] sm:$0xff] }
  0x19   :  { %121 = vmatpush1.msra.mxu0 %v45_v31  ;;  %1946 = vmatpush3.msra.mxu1 %v53_v39  ;;  %v2708_v10 = vld [vmem:[%s3770_s2 + $0x90] sm:$0xff]  ;;  %v30_v11 = vld [vmem:[%s3769_s0 + $0x28] sm:$0xff]  ;;  %v2718_v12 = vld [vmem:[%s3770_s2 + $0x80] sm:$0xff] }
  0x1a   :  { %122 = vmatprep.subr.mxu0 %v43_v32  ;;  %1947 = vmatprep.subr.mxu1 %v50_v42  ;;  %v2724_v13 = vld [vmem:[%s3770_s2 + $0x78] sm:$0xff]  ;;  %v2730_v14 = vld [vmem:[%s3770_s2 + $0x68] sm:$0xff]  ;;  %v2736_v15 = vld [vmem:[%s3770_s2 + $0x60] sm:$0xff] }
  0x1b   :  { %123 = vmatpush1.msra.mxu0 %v42_v34  ;;  %1948 = vmatpush3.msra.mxu1 %v50_v42  ;;  %v31_v16 = vld [vmem:[%s3769_s0 + $0x30] sm:$0xff]  ;;  %v2752_v18 = vld [vmem:[%s3770_s2 + $0x48] sm:$0xff]  ;;  %v2759_v19 = vld [vmem:[%s3770_s2 + $0x38] sm:$0xff]  ;;  %v83_v42 = vlaneseq }
  0x1c   :  { %124 = vmatprep.subr.mxu0 %v40_v35  ;;  %1949 = vmatprep.subr.mxu1 %v47_v48  ;;  %v2746_v17 = vld [vmem:[%s3770_s2 + $0x50] sm:$0xff]  ;;  %v2771_v21 = vld [vmem:[%s3770_s2 + $0x178] sm:$0xff]  ;;  %v2781_v23 = vld [vmem:[%s3770_s2 + $0x20] sm:$0xff] }
  0x1d   :  { %125 = vmatpush1.msra.mxu0 %v39_v37  ;;  %1950 = vmatpush3.msra.mxu1 %v47_v48  ;;  %v2766_v20 = vld [vmem:[%s3770_s2 + $0x30] sm:$0xff]  ;;  %v32_v22 = vld [vmem:[%s3769_s0 + $0x38] sm:$0xff]  ;;  %v2794_v25 = vld [vmem:[%s3770_s2 + $0x8] sm:$0xff] }
  0x1e   :  { %126 = vmatprep.subr.mxu0 %v37_v38  ;;  %1951 = vmatprep.subr.mxu1 %v44_v54  ;;  %v2787_v24 = vld [vmem:[%s3770_s2 + $0x18] sm:$0xff]  ;;  %3795 = vst [vmem:[#allocation6_spill] sm:$0xff] %v2794_v25  ;;  %v2801_v26 = vld [vmem:[%s3770_s2] sm:$0xff]  ;;  %v2815_v28 = vld [vmem:[%s3770_s2 + $0x148] sm:$0xff] }
  0x1f   :  { %127 = vmatpush1.msra.mxu0 %v36_v40  ;;  %1952 = vmatpush3.msra.mxu1 %v44_v54  ;;  %3794 = vst [vmem:[#allocation5_spill] sm:$0xff] %v2787_v24  ;;  %3796 = vst [vmem:[#allocation7_spill] sm:$0xff] %v2801_v26  ;;  %v2806_v27 = vld [vmem:[%s3770_s2 + $0x160] sm:$0xff]  ;;  %v2824_v29 = vld [vmem:[%s3770_s2 + $0x130] sm:$0xff] }
  0x20   :  { %128 = vmatprep.subr.mxu0 %v34_v41  ;;  %1953 = vmatprep.subr.mxu1 %v41_v60  ;;  %v2832_v30 = vld [vmem:[%s3770_s2 + $0x118] sm:$0xff]  ;;  %v2841_v31 = vld [vmem:[%s3770_s2 + $0x100] sm:$0xff]  ;;  %v2850_v32 = vld [vmem:[%s3770_s2 + $0xe8] sm:$0xff] }
  0x21   :  { %129 = vmatpush1.msra.mxu0 %v33_v43  ;;  %1954 = vmatpush3.msra.mxu1 %v41_v60  ;;  %v2857_v33 = vld [vmem:[%s3770_s2 + $0xd0] sm:$0xff]  ;;  %v2866_v34 = vld [vmem:[%s3770_s2 + $0xb8] sm:$0xff]  ;;  %v2875_v35 = vld [vmem:[%s3770_s2 + $0xa0] sm:$0xff]  ;;  %v84_v43 = vshrl.u32 %v83_v42, 7 }
  0x22   :  { %163 = vmatmul.mubr.f32.vlgmr.msra.gmra.mxu0 %v2547_v44  ;;  %399 = vmatprep.subr.mxu0 %v2552_v45  ;;  %v2884_v36 = vld [vmem:[%s3770_s2 + $0x88] sm:$0xff]  ;;  %v2893_v37 = vld [vmem:[%s3770_s2 + $0x70] sm:$0xff]  ;;  %v2902_v38 = vld [vmem:[%s3770_s2 + $0x58] sm:$0xff] }
  0x23   :  { %400 = vmatpush1.msra.mxu0 %v2557_v46  ;;  %168 = vmatprep.mubr.f32.mxu0 %v3774_v3  ;;  %v2911_v39 = vld [vmem:[%s3770_s2 + $0x40] sm:$0xff]  ;;  %v2920_v40 = vld [vmem:[%s3770_s2 + $0x28] sm:$0xff]  ;;  %v2929_v41 = vld [vmem:[%s3770_s2 + $0x10] sm:$0xff]  ;;  %v89_v54 = vsub.s32 1, %v84_v43 }
  0x24   :  { %401 = vmatprep.subr.mxu0 %v2562_v47  ;;  %1955 = vmatprep.subr.mxu1 %v38_v2  ;;  %3797 = vst [vmem:[#allocation8_spill] sm:$0xff] %v2920_v40  ;;  %3798 = vst [vmem:[#allocation9_spill] sm:$0xff] %v2929_v41  ;;  %v81_v48 = vld [vmem:[%s3771_s3] sm:$0x7] }
  0x25   :  { %402 = vmatpush1.msra.mxu0 %v2572_v49  ;;  %1956 = vmatpush3.msra.mxu1 %v38_v2  ;;  %v90_v2 = vrot.slane %v81_v48, %v89_v54 }
  0x26   :  { %169 = vmatmul.mubr.f32.gmra.mxu0 %v2579_v50  ;;  %403 = vmatprep.subr.mxu0 %v2584_v51 }
  0x27   :  { %404 = vmatpush1.msra.mxu0 %v2590_v52  ;;  %174 = vmatprep.mubr.f32.mxu0 %v3774_v3 }
  0x28   :  { %405 = vmatprep.subr.mxu0 %v2596_v53  ;;  %1957 = vmatprep.subr.mxu1 %v35_v9 }
  0x29   :  { %406 = vmatpush1.msra.mxu0 %v2606_v55  ;;  %1958 = vmatpush3.msra.mxu1 %v35_v9 }
  0x2a   :  { %175 = vmatmul.mubr.f32.gmra.mxu0 %v2613_v56  ;;  %407 = vmatprep.subr.mxu0 %v2618_v57 }
  0x2b   :  { %408 = vmatpush1.msra.mxu0 %v2624_v58  ;;  %180 = vmatprep.mubr.f32.mxu0 %v3774_v3 }
  0x2c   :  { %409 = vmatprep.subr.mxu0 %v2630_v59  ;;  %1959 = vmatprep.mubr.f32.mxu1 %v2547_v44  ;;  %v85_v44 = vsub.s32 0, %v84_v43 }
  0x2d   :  { %410 = vmatpush1.msra.mxu0 %v2640_v61  ;;  %1971 = vmatprep.subr.mxu1 %v3774_v3 }
  0x2e   :  { %181 = vmatmul.mubr.f32.gmra.mxu0 %v2647_v62  ;;  %411 = vmatprep.subr.mxu0 %v2652_v63  ;;  %v86_v60 = vrot.slane %v81_v48, %v85_v44 }
  0x2f   :  { %412 = vmatpush1.msra.mxu0 %v2658_v0  ;;  %186 = vmatprep.mubr.f32.mxu0 %v3774_v3 }
  0x30   :  { %413 = vmatprep.subr.mxu0 %v2664_v1  ;;  %1960 = vmatmul.mubr.f32.vlgmr.msra.gmra.mxu1 %v2579_v50 }
  0x31   :  { %414 = vmatpush1.msra.mxu0 %v2674_v4  ;;  %1972 = vmatpush3.msra.mxu1 %v2771_v21 }
  0x32   :  { %187 = vmatmul.mubr.f32.gmra.mxu0 %v2681_v5  ;;  %415 = vmatprep.subr.mxu0 %v2686_v6 }
  0x33   :  { %416 = vmatpush1.msra.mxu0 %v2692_v7  ;;  %192 = vmatprep.mubr.f32.mxu0 %v3774_v3 }
  0x34   :  { %417 = vmatprep.subr.mxu0 %v2698_v8  ;;  %1973 = vmatprep.subr.mxu1 %v3774_v3 }
  0x35   :  { %418 = vmatpush1.msra.mxu0 %v2708_v10  ;;  %1974 = vmatpush3.msra.mxu1 %v2806_v27 }
  0x36   :  { %193 = vmatmul.mubr.f32.gmra.mxu0 %v30_v11  ;;  %419 = vmatprep.subr.mxu0 %v2718_v12 }
  0x37   :  { %420 = vmatpush1.msra.mxu0 %v2724_v13  ;;  %198 = vmatprep.mubr.f32.mxu0 %v3774_v3 }
  0x38   :  { %421 = vmatprep.subr.mxu0 %v2730_v14  ;;  %1975 = vmatprep.subr.mxu1 %v3774_v3 }
  0x39   :  { %422 = vmatpush1.msra.mxu0 %v2736_v15  ;;  %1976 = vmatpush3.msra.mxu1 %v2815_v28 }
  0x3a   :  { %199 = vmatmul.mubr.f32.gmra.mxu0 %v31_v16  ;;  %423 = vmatprep.subr.mxu0 %v2746_v17 }
  0x3b   :  { %424 = vmatpush1.msra.mxu0 %v2752_v18  ;;  %204 = vmatprep.mubr.f32.mxu0 %v3774_v3 }
  0x3c   :  { %425 = vmatprep.subr.mxu0 %v2759_v19  ;;  %1962 = vmatprep.mubr.f32.mxu1 %v2613_v56 }
  0x3d   :  { %426 = vmatpush1.msra.mxu0 %v2766_v20  ;;  %1977 = vmatprep.subr.mxu1 %v3774_v3 }
  0x3e   :  { %205 = vmatmul.mubr.f32.gmra.mxu0 %v32_v22  ;;  %427 = vmatprep.subr.mxu0 %v2781_v23 }
  0x3f   :  { %428 = vmatpush1.msra.mxu0 %v2787_v24  ;;  %463 = vmatprep.mubr.f32.mxu0 %v3774_v3 }
  0x40   :  { %429 = vmatprep.subr.mxu0 %v2794_v25  ;;  %1963 = vmatmul.mubr.f32.gmra.mxu1 %v2647_v62 }
  0x41   :  { %430 = vmatpush1.msra.mxu0 %v2801_v26  ;;  %1978 = vmatpush3.msra.mxu1 %v2824_v29 }
  0x42   :  { %464 = vmatmul.mubr.f32.vlgmr.msra.gmra.mxu0 %v3774_v3  ;;  %1965 = vmatprep.mubr.f32.mxu1 %v2681_v5 }
  0x43   :  { %1979 = vmatprep.subr.mxu1 %v3774_v3  ;;  %566 = vmatprep.subr.mxu0 %v2552_v45 }
  0x44   :  { %1980 = vmatpush3.msra.mxu1 %v2832_v30  ;;  %567 = vmatpush1.msra.mxu0 %v2557_v46 }
  0x45   :  { %1981 = vmatprep.subr.mxu1 %v3774_v3  ;;  %1966 = vmatmul.mubr.f32.gmra.mxu1 %v30_v11 }
  0x46   :  { %1982 = vmatpush3.msra.mxu1 %v2841_v31  ;;  %1968 = vmatprep.mubr.f32.mxu1 %v31_v16 }
  0x47   :  { %1983 = vmatprep.subr.mxu1 %v3774_v3  ;;  %568 = vmatprep.subr.mxu0 %v2562_v47 }
  0x48   :  { %1984 = vmatpush3.msra.mxu1 %v2850_v32  ;;  %569 = vmatpush1.msra.mxu0 %v2572_v49 }
  0x49   :  { %1985 = vmatprep.subr.mxu1 %v3774_v3  ;;  %1969 = vmatmul.mubr.f32.gmra.mxu1 %v32_v22 }
  0x4a   :  { %1986 = vmatpush3.msra.mxu1 %v2857_v33  ;;  %2003 = vmatprep.mubr.msk.f32.mxu1 %vm2383_vm0, %v3774_v3 }
  0x4b   :  { %1987 = vmatprep.subr.mxu1 %v3774_v3  ;;  %570 = vmatprep.subr.mxu0 %v2584_v51 }
  0x4c   :  { %1988 = vmatpush3.msra.mxu1 %v2866_v34  ;;  %571 = vmatpush1.msra.mxu0 %v2590_v52 }
  0x4d   :  { %1989 = vmatprep.subr.mxu1 %v3774_v3  ;;  %572 = vmatprep.subr.mxu0 %v2596_v53 }
  0x4e   :  { %1990 = vmatpush3.msra.mxu1 %v2875_v35  ;;  %573 = vmatpush1.msra.mxu0 %v2606_v55 }
  0x4f   :  { %1991 = vmatprep.subr.mxu1 %v3774_v3  ;;  %574 = vmatprep.subr.mxu0 %v2618_v57 }
  0x50   :  { %1992 = vmatpush3.msra.mxu1 %v2884_v36  ;;  %575 = vmatpush1.msra.mxu0 %v2624_v58 }
  0x51   :  { %1993 = vmatprep.subr.mxu1 %v3774_v3  ;;  %576 = vmatprep.subr.mxu0 %v2630_v59 }
  0x52   :  { %1994 = vmatpush3.msra.mxu1 %v2893_v37  ;;  %577 = vmatpush1.msra.mxu0 %v2640_v61 }
  0x53   :  { %1995 = vmatprep.subr.mxu1 %v3774_v3  ;;  %578 = vmatprep.subr.mxu0 %v2652_v63 }
  0x54   :  { %1996 = vmatpush3.msra.mxu1 %v2902_v38  ;;  %579 = vmatpush1.msra.mxu0 %v2658_v0 }
  0x55   :  { %1997 = vmatprep.subr.mxu1 %v3774_v3  ;;  %580 = vmatprep.subr.mxu0 %v2664_v1 }
  0x56   :  { %1998 = vmatpush3.msra.mxu1 %v2911_v39  ;;  %581 = vmatpush1.msra.mxu0 %v2674_v4 }
  0x57   :  { %1999 = vmatprep.subr.mxu1 %v3774_v3  ;;  %582 = vmatprep.subr.mxu0 %v2686_v6 }
  0x58   :  { %2000 = vmatpush3.msra.mxu1 %v2920_v40  ;;  %583 = vmatpush1.msra.mxu0 %v2692_v7 }
  0x59   :  { %2001 = vmatprep.subr.mxu1 %v3774_v3  ;;  %584 = vmatprep.subr.mxu0 %v2698_v8 }
  0x5a   :  { %2002 = vmatpush3.msra.mxu1 %v2929_v41  ;;  %585 = vmatpush1.msra.mxu0 %v2708_v10 }
  0x5b   :  { %2004 = vmatmul.mubr.f32.vlgmr.msra.gmra.mxu1 %v3774_v3  ;;  %2006 = vmatprep.subr.mxu1 %v3774_v3 }
  0x5c   :  { %2007 = vmatpush3.msra.mxu1 %v2771_v21  ;;  %586 = vmatprep.subr.mxu0 %v2718_v12 }
  0x5d   :  { %2008 = vmatprep.subr.mxu1 %v3774_v3  ;;  %587 = vmatpush1.msra.mxu0 %v2724_v13 }
  0x5e   :  { %2009 = vmatpush3.msra.mxu1 %v2806_v27  ;;  %588 = vmatprep.subr.mxu0 %v2730_v14 }
  0x5f   :  { %2010 = vmatprep.subr.mxu1 %v3774_v3  ;;  %589 = vmatpush1.msra.mxu0 %v2736_v15 }
  0x60   :  { %2011 = vmatpush3.msra.mxu1 %v2815_v28  ;;  %590 = vmatprep.subr.mxu0 %v2746_v17 }
  0x61   :  { %2012 = vmatprep.subr.mxu1 %v3774_v3  ;;  %591 = vmatpush1.msra.mxu0 %v2752_v18 }
  0x62   :  { %2013 = vmatpush3.msra.mxu1 %v2824_v29  ;;  %592 = vmatprep.subr.mxu0 %v2759_v19 }
  0x63   :  { %2014 = vmatprep.subr.mxu1 %v3774_v3  ;;  %593 = vmatpush1.msra.mxu0 %v2766_v20 }
  0x64   :  { %2015 = vmatpush3.msra.mxu1 %v2832_v30  ;;  %594 = vmatprep.subr.mxu0 %v2781_v23 }
  0x65   :  { %2016 = vmatprep.subr.mxu1 %v3774_v3  ;;  %595 = vmatpush1.msra.mxu0 %v2787_v24 }
  0x66   :  { %2017 = vmatpush3.msra.mxu1 %v2841_v31  ;;  %596 = vmatprep.subr.mxu0 %v2794_v25 }
  0x67   :  { %2018 = vmatprep.subr.mxu1 %v3774_v3  ;;  %597 = vmatpush1.msra.mxu0 %v2801_v26 }
  0x68   :  { %2019 = vmatpush3.msra.mxu1 %v2850_v32  ;;  %630 = vmatprep.mubr.f32.mxu0 %v3774_v3 }
  0x69   :  { %2020 = vmatprep.subr.mxu1 %v3774_v3  ;;  %2038 = vmatprep.mubr.msk.f32.mxu1 %vm2383_vm0, %v3774_v3 }
  0x6a   :  { %2021 = vmatpush3.msra.mxu1 %v2857_v33  ;;  %734 = vmatprep.subr.mxu0 %v2552_v45 }
  0x6b   :  { %2022 = vmatprep.subr.mxu1 %v3774_v3 }
  0x6c   :  { %2023 = vmatpush3.msra.mxu1 %v2866_v34 }
  0x6d   :  { %2024 = vmatprep.subr.mxu1 %v3774_v3 }
  0x6e   :  { %2025 = vmatpush3.msra.mxu1 %v2875_v35 }
  0x6f   :  { %2026 = vmatprep.subr.mxu1 %v3774_v3 }
  0x70   :  { %2027 = vmatpush3.msra.mxu1 %v2884_v36 }
  0x71   :  { %2028 = vmatprep.subr.mxu1 %v3774_v3 }
  0x72   :  { %2029 = vmatpush3.msra.mxu1 %v2893_v37 }
  0x73   :  { %2030 = vmatprep.subr.mxu1 %v3774_v3 }
  0x74   :  { %2031 = vmatpush3.msra.mxu1 %v2902_v38 }
  0x75   :  { %2032 = vmatprep.subr.mxu1 %v3774_v3 }
  0x76   :  { %2033 = vmatpush3.msra.mxu1 %v2911_v39 }
  0x77   :  { %2034 = vmatprep.subr.mxu1 %v3774_v3 }
  0x78   :  { %2035 = vmatpush3.msra.mxu1 %v2920_v40 }
  0x79   :  { %2036 = vmatprep.subr.mxu1 %v3774_v3 }
  0x7a   :  { %2037 = vmatpush3.msra.mxu1 %v2929_v41 }
  0x7b   :  { %2041 = vmatprep.subr.mxu1 %v3774_v3 }
  0xe2   :  { %v164_v50 = vpop.f32.mrf.mxu0 }
  0xe4   :  { %v166_v56 = vpop.f32.mrf.mxu0 }
  0xe6   :  { %v170_v62 = vpop.f32.mrf.mxu0 }
  0xe7   :  { %v2991_v5 = vadd.f32 %v170_v62, %v86_v60 }
  0xe8   :  { %v172_v9 = vpop.f32.mrf.mxu0 }
  0xe9   :  { %3799 = vst [vmem:[#allocation10_spill] sm:$0xff] %v2991_v5  ;;  %v2993_v11 = vadd.f32 %v172_v9, %v90_v2  ;;  %v93_v9 = vsub.s32 2, %v84_v43 }
  0xea   :  { %v176_v16 = vpop.f32.mrf.mxu0 }
  0xeb   :  { %3800 = vst [vmem:[#allocation11_spill] sm:$0xff] %v2993_v11  ;;  %v2995_v22 = vadd.f32 %v176_v16, %v86_v60 }
  0xec   :  { %v178_v42 = vpop.f32.mrf.mxu0 }
  0xed   :  { %3801 = vst [vmem:[#allocation12_spill] sm:$0xff] %v2995_v22  ;;  %v2997_v3 = vadd.f32 %v178_v42, %v90_v2  ;;  %v94_v42 = vrot.slane %v81_v48, %v93_v9 }
  0xee   :  { %v182_v45 = vpop.f32.mrf.mxu0 }
  0xef   :  { %3802 = vst [vmem:[#allocation13_spill] sm:$0xff] %v2997_v3  ;;  %v2999_v41 = vadd.f32 %v182_v45, %v86_v60 }
  0xf0   :  { %v184_v26 = vpop.f32.mrf.mxu0 }
  0xf1   :  { %3803 = vst [vmem:[#allocation14_spill] sm:$0xff] %v2999_v41  ;;  %v3001_v25 = vadd.f32 %v184_v26, %v90_v2  ;;  %v1961_v26 = vpop.f32.mrf.mxu1 }
  0xf2   :  { %v188_v44 = vpop.f32.mrf.mxu0 }
  0xf3   :  { %3804 = vst [vmem:[#allocation15_spill] sm:$0xff] %v3001_v25  ;;  %v3003_v40 = vadd.f32 %v188_v44, %v86_v60  ;;  %v3015_v44 = vadd.f32 %v1961_v26, %v94_v42 }
  0xf4   :  { %v190_v54 = vpop.f32.mrf.mxu0 }
  0xf5   :  { %3805 = vst [vmem:[#allocation16_spill] sm:$0xff] %v3003_v40  ;;  %v3005_v62 = vadd.f32 %v190_v54, %v90_v2  ;;  %3811 = vst [vmem:[#allocation22_spill] sm:$0xff] %v3015_v44 }
  0xf6   :  { %v194_v11 = vpop.f32.mrf.mxu0 }
  0xf7   :  { %3806 = vst [vmem:[#allocation17_spill] sm:$0xff] %v3005_v62  ;;  %v3007_v5 = vadd.f32 %v194_v11, %v86_v60  ;;  %v165_v62 = vadd.f32 %v164_v50, %v86_v60  ;;  %v167_v50 = vadd.f32 %v166_v56, %v90_v2 }
  0xf8   :  { %v196_v16 = vpop.f32.mrf.mxu0 }
  0xf9   :  { %3807 = vst [vmem:[#allocation18_spill] sm:$0xff] %v3007_v5  ;;  %v3009_v22 = vadd.f32 %v196_v16, %v90_v2  ;;  %v277_v16 = vpop.f32.mrf.mxu1 }
  0xfa   :  { %v200_v3 = vpop.f32.mrf.mxu0 }
  0xfb   :  { %3808 = vst [vmem:[#allocation19_spill] sm:$0xff] %v3009_v22  ;;  %v3011_v45 = vadd.f32 %v200_v3, %v86_v60 }
  0xfc   :  { %v202_v41 = vpop.f32.mrf.mxu0 }
  0xfd   :  { %3809 = vst [vmem:[#allocation20_spill] sm:$0xff] %v3011_v45  ;;  %v3013_v25 = vadd.f32 %v202_v41, %v90_v2 }
  0xfe   :  { %v206_v40 = vpop.f32.mrf.mxu0 }
  0xff   :  { %3810 = vst [vmem:[#allocation21_spill] sm:$0xff] %v3013_v25  ;;  %v3017_v54 = vadd.f32 %v206_v40, %v86_v60 }
 0x100   :  { %v208_v43 = vpop.f32.mrf.mxu0  ;;  %v1964_v48 = vpop.f32.mrf.mxu1 }
 0x101   :  { %3812 = vst [vmem:[#allocation23_spill] sm:$0xff] %v3017_v54  ;;  %v3019_v11 = vadd.f32 %v208_v43, %v90_v2  ;;  %v3021_v3 = vadd.f32 %v1964_v48, %v94_v42 }
 0x102   :  { %v465_v5 = vpop.f32.mrf.mxu0  ;;  %v287_v45 = vpop.f32.mrf.mxu1 }
 0x103   :  { %3813 = vst [vmem:[#allocation24_spill] sm:$0xff] %v3019_v11  ;;  %v540_v22 = vadd.f32 %v465_v5, %v165_v62  ;;  %3814 = vst [vmem:[#allocation25_spill] sm:$0xff] %v3021_v3  ;;  %v3023_v41 = vadd.f32 %v287_v45, %v94_v42  ;;  %v3036_v45 = vld [vmem:[%s3772_s4] ss:$0 sm:$0xff] }
 0x104   :  { %v467_v54 = vpop.f32.mrf.mxu0 }
 0x105   :  { %v1744_v9 = vmul.f32 -1.442695, %v540_v22  ;;  %3815 = vst [vmem:[#allocation26_spill] sm:$0xff] %v3023_v41  ;;  %v1967_v26 = vpop.f32.mrf.mxu1  ;;  %v547_v5 = vadd.f32 %v467_v54, %v167_v50  ;;  %v278_v54 = vadd.f32 %v277_v16, %v94_v42  ;;  %v3821_v16 = vld [vmem:[#allocation8_spill] sm:$0xff] }
 0x106   :  { %v3025_v25 = vadd.f32 %v1967_v26, %v94_v42 }
 0x107   :  { %2253 = vpow2.f32 %v1744_v9  ;;  %v297_v40 = vpop.f32.mrf.mxu1  ;;  %v1745_v48 = vmul.f32 -1.442695, %v547_v5 }
 0x108   :  { %3816 = vst [vmem:[#allocation27_spill] sm:$0xff] %v3025_v25  ;;  %v3027_v44 = vadd.f32 %v297_v40, %v94_v42 }
 0x109   :  { %v1970_v60 = vpop.f32.mrf.mxu1  ;;  %2255 = vpow2.f32 %v1745_v48 }
 0x10a   :  { %3817 = vst [vmem:[#allocation28_spill] sm:$0xff] %v3027_v44  ;;  %v3029_v43 = vadd.f32 %v1970_v60, %v94_v42 }
 0x10b   :  { %v307_v62 = vpop.f32.mrf.mxu1 }
 0x10c   :  { %3818 = vst [vmem:[#allocation29_spill] sm:$0xff] %v3029_v43  ;;  %v3031_v22 = vadd.f32 %v307_v62, %v94_v42  ;;  %v3820_v42 = vmov 0.0  }
 0x10e   :  { %3819 = vst [vmem:[#allocation30_spill] sm:$0xff] %v3031_v22 }
 0x114   :  { %v2254_v11 = vpop.eup %2253 }
 0x115   :  { %v544_v9 = vadd.f32 1.0, %v2254_v11 }
 0x116   :  { %v2256_v2 = vpop.eup %2255 }
 0x117   :  { %2257 = vrcp.f32 %v544_v9  ;;  %v551_v62 = vadd.f32 1.0, %v2256_v2 }
 0x11b   :  { %v536_v26 = vpop.f32.mrf.mxu1 }
 0x11c   :  { %v554_v56 = vadd.f32 %v3036_v45, %v536_v26  ;;  %v3823_v26 = vld [vmem:[#allocation7_spill] sm:$0xff] }
 0x11d   :  { %v2005_v40 = vpop.f32.mrf.mxu1 }
 0x11e   :  { %v3824_v40 = vld [vmem:[#allocation9_spill] sm:$0xff] }
 0x124   :  { %v2258_v60 = vpop.eup %2257 }
 0x125   :  { %v555_v50 = vmul.f32 %v2258_v60, %v554_v56  ;;  %v3825_v56 = vld [vmem:[#allocation4_spill] sm:$0xff] }
 0x127   :  { %v556_v43 = vadd.f32 %v555_v50, %v278_v54  ;;  %v3826_v54 = vld [vmem:[#allocation10_spill] sm:$0xff] }
 0x129   :  { %2259 = vtanh.f32 %v556_v43  ;;  %v3822_v43 = vld [vmem:[#allocation6_spill] sm:$0xff] }
 0x12a   :  { %2261 = vrcp.f32 %v551_v62 }
 0x136   :  { %v2260_v11 = vpop.eup %2259 }
 0x137   :  { %v558_v5 = vsub.f32 0.0, %v2260_v11  ;;  %v2262_v48 = vpop.eup %2261 }
 0x139   :  { %v559_v9 = vmul.f32 %v2262_v48, %v558_v5  ;;  %v3827_v48 = vld [vmem:[#allocation11_spill] sm:$0xff] }
 0x13b   :  { %v3039_v22 = vadd.f32 %v2260_v11, %v559_v9 }
 0x13d   :  { %561 = vst [vmem:[%s3773_s5] sm:$0xff] %v3039_v22  ;;  %631 = vmatmul.mubr.f32.vlgmr.msra.gmra.mxu0 %v3039_v22  ;;  %2039 = vmatmul.mubr.f32.vlgmr.msra.gmra.mxu1 %v3039_v22 }
 0x13e   :  { %735 = vmatpush1.msra.mxu0 %v2557_v46  ;;  %2042 = vmatpush3.msra.mxu1 %v2771_v21 }
 0x13f   :  { %736 = vmatprep.subr.mxu0 %v2562_v47  ;;  %2043 = vmatprep.subr.mxu1 %v3820_v42 }
 0x140   :  { %737 = vmatpush1.msra.mxu0 %v2572_v49  ;;  %2044 = vmatpush3.msra.mxu1 %v2806_v27 }
 0x141   :  { %738 = vmatprep.subr.mxu0 %v2584_v51  ;;  %2045 = vmatprep.subr.mxu1 %v3820_v42 }
 0x142   :  { %739 = vmatpush1.msra.mxu0 %v2590_v52  ;;  %2046 = vmatpush3.msra.mxu1 %v2815_v28 }
 0x143   :  { %740 = vmatprep.subr.mxu0 %v2596_v53  ;;  %2047 = vmatprep.subr.mxu1 %v3820_v42 }
 0x144   :  { %741 = vmatpush1.msra.mxu0 %v2606_v55  ;;  %2048 = vmatpush3.msra.mxu1 %v2824_v29 }
 0x145   :  { %742 = vmatprep.subr.mxu0 %v2618_v57  ;;  %2049 = vmatprep.subr.mxu1 %v3820_v42 }
 0x146   :  { %743 = vmatpush1.msra.mxu0 %v2624_v58  ;;  %2050 = vmatpush3.msra.mxu1 %v2832_v30 }
 0x147   :  { %744 = vmatprep.subr.mxu0 %v2630_v59  ;;  %2051 = vmatprep.subr.mxu1 %v3820_v42 }
 0x148   :  { %745 = vmatpush1.msra.mxu0 %v2640_v61  ;;  %2052 = vmatpush3.msra.mxu1 %v2841_v31 }
 0x149   :  { %746 = vmatprep.subr.mxu0 %v2652_v63  ;;  %2053 = vmatprep.subr.mxu1 %v3820_v42 }
 0x14a   :  { %747 = vmatpush1.msra.mxu0 %v2658_v0  ;;  %2054 = vmatpush3.msra.mxu1 %v2850_v32 }
 0x14b   :  { %748 = vmatprep.subr.mxu0 %v2664_v1  ;;  %2055 = vmatprep.subr.mxu1 %v3820_v42 }
 0x14c   :  { %749 = vmatpush1.msra.mxu0 %v2674_v4  ;;  %2056 = vmatpush3.msra.mxu1 %v2857_v33 }
 0x14d   :  { %750 = vmatprep.subr.mxu0 %v2686_v6  ;;  %2057 = vmatprep.subr.mxu1 %v3820_v42 }
 0x14e   :  { %751 = vmatpush1.msra.mxu0 %v2692_v7  ;;  %2058 = vmatpush3.msra.mxu1 %v2866_v34 }
 0x14f   :  { %752 = vmatprep.subr.mxu0 %v2698_v8  ;;  %2059 = vmatprep.subr.mxu1 %v3820_v42 }
 0x150   :  { %753 = vmatpush1.msra.mxu0 %v2708_v10  ;;  %2060 = vmatpush3.msra.mxu1 %v2875_v35 }
 0x151   :  { %754 = vmatprep.subr.mxu0 %v2718_v12  ;;  %2061 = vmatprep.subr.mxu1 %v3820_v42 }
 0x152   :  { %755 = vmatpush1.msra.mxu0 %v2724_v13  ;;  %2062 = vmatpush3.msra.mxu1 %v2884_v36 }
 0x153   :  { %756 = vmatprep.subr.mxu0 %v2730_v14  ;;  %2063 = vmatprep.subr.mxu1 %v3820_v42 }
 0x154   :  { %757 = vmatpush1.msra.mxu0 %v2736_v15  ;;  %2064 = vmatpush3.msra.mxu1 %v2893_v37 }
 0x155   :  { %758 = vmatprep.subr.mxu0 %v2746_v17  ;;  %2065 = vmatprep.subr.mxu1 %v3820_v42 }
 0x156   :  { %759 = vmatpush1.msra.mxu0 %v2752_v18  ;;  %2066 = vmatpush3.msra.mxu1 %v2902_v38 }
 0x157   :  { %760 = vmatprep.subr.mxu0 %v2759_v19  ;;  %2067 = vmatprep.subr.mxu1 %v3820_v42 }
 0x158   :  { %761 = vmatpush1.msra.mxu0 %v2766_v20  ;;  %2068 = vmatpush3.msra.mxu1 %v2911_v39 }
 0x159   :  { %762 = vmatprep.subr.mxu0 %v2781_v23  ;;  %2069 = vmatprep.subr.mxu1 %v3820_v42 }
 0x15a   :  { %763 = vmatpush1.msra.mxu0 %v2787_v24  ;;  %2070 = vmatpush3.msra.mxu1 %v3821_v16 }
 0x15b   :  { %764 = vmatprep.subr.mxu0 %v3822_v43  ;;  %2071 = vmatprep.subr.mxu1 %v3820_v42  ;;  %v3828_v43 = vld [vmem:[#allocation22_spill] sm:$0xff] }
 0x15c   :  { %765 = vmatpush1.msra.mxu0 %v3823_v26  ;;  %798 = vmatprep.mubr.f32.mxu0 %v3820_v42 }
 0x15d   :  { %2072 = vmatpush3.msra.mxu1 %v3824_v40  ;;  %2073 = vmatprep.mubr.msk.f32.mxu1 %vm2383_vm0, %v3820_v42 }
 0x15e   :  { %902 = vmatprep.subr.mxu0 %v3825_v56  ;;  %2076 = vmatprep.subr.mxu1 %v3820_v42 }
 0x1fd   :  { %v632_v2 = vpop.f32.mrf.mxu0  ;;  %v703_v60 = vpop.f32.mrf.mxu1 }
 0x1fe   :  { %v707_v50 = vadd.f32 %v632_v2, %v3826_v54  ;;  %v721_v56 = vadd.f32 %v3036_v45, %v703_v60 }
 0x1ff   :  { %v2040_v62 = vpop.f32.mrf.mxu1  ;;  %v634_v5 = vpop.f32.mrf.mxu0 }
 0x200   :  { %v1746_v11 = vmul.f32 -1.442695, %v707_v50  ;;  %v714_v9 = vadd.f32 %v634_v5, %v3827_v48  ;;  %v3836_v5 = vld [vmem:[#allocation13_spill] sm:$0xff] }
 0x202   :  { %2263 = vpow2.f32 %v1746_v11  ;;  %v1747_v25 = vmul.f32 -1.442695, %v714_v9 }
 0x204   :  { %2265 = vpow2.f32 %v1747_v25  ;;  %v3831_v25 = vld [vmem:[#allocation6_spill] sm:$0xff] }
 0x20f   :  { %v2264_v44 = vpop.eup %2263 }
 0x210   :  { %v711_v3 = vadd.f32 1.0, %v2264_v44  ;;  %v3832_v44 = vld [vmem:[#allocation7_spill] sm:$0xff] }
 0x211   :  { %v2266_v41 = vpop.eup %2265 }
 0x212   :  { %2267 = vrcp.f32 %v711_v3  ;;  %v718_v24 = vadd.f32 1.0, %v2266_v41  ;;  %v3833_v3 = vld [vmem:[#allocation9_spill] sm:$0xff]  ;;  %v3834_v41 = vld [vmem:[#allocation4_spill] sm:$0xff] }
 0x21f   :  { %v2268_v40 = vpop.eup %2267 }
 0x220   :  { %v722_v26 = vmul.f32 %v2268_v40, %v721_v56 }
 0x222   :  { %v723_v16 = vadd.f32 %v722_v26, %v3828_v43  ;;  %v3835_v43 = vld [vmem:[#allocation12_spill] sm:$0xff] }
 0x224   :  { %2269 = vtanh.f32 %v723_v16 }
 0x225   :  { %2271 = vrcp.f32 %v718_v24  ;;  %v3830_v24 = vld [vmem:[#allocation8_spill] sm:$0xff] }
 0x231   :  { %v2270_v2 = vpop.eup %2269 }
 0x232   :  { %v725_v54 = vsub.f32 %v3039_v22, %v2270_v2  ;;  %v2272_v50 = vpop.eup %2271 }
 0x234   :  { %v726_v62 = vmul.f32 %v2272_v50, %v725_v54 }
 0x236   :  { %v3119_v11 = vadd.f32 %v2270_v2, %v726_v62 }
 0x238   :  { %1748 = vst [vmem:[%s3773_s5 + $0x8] sm:$0xff] %v3119_v11  ;;  %799 = vmatmul.mubr.f32.vlgmr.msra.gmra.mxu0 %v3119_v11  ;;  %2074 = vmatmul.mubr.f32.vlgmr.msra.gmra.mxu1 %v3119_v11 }
 0x239   :  { %903 = vmatpush1.msra.mxu0 %v2557_v46  ;;  %2077 = vmatpush3.msra.mxu1 %v2771_v21  ;;  %v3829_v46 = vld [vmem:[#allocation5_spill] sm:$0xff] }
 0x23a   :  { %904 = vmatprep.subr.mxu0 %v2562_v47  ;;  %2078 = vmatprep.subr.mxu1 %v3820_v42 }
 0x23b   :  { %905 = vmatpush1.msra.mxu0 %v2572_v49  ;;  %2079 = vmatpush3.msra.mxu1 %v2806_v27 }
 0x23c   :  { %906 = vmatprep.subr.mxu0 %v2584_v51  ;;  %2080 = vmatprep.subr.mxu1 %v3820_v42 }
 0x23d   :  { %907 = vmatpush1.msra.mxu0 %v2590_v52  ;;  %2081 = vmatpush3.msra.mxu1 %v2815_v28 }
 0x23e   :  { %908 = vmatprep.subr.mxu0 %v2596_v53  ;;  %2082 = vmatprep.subr.mxu1 %v3820_v42 }
 0x23f   :  { %909 = vmatpush1.msra.mxu0 %v2606_v55  ;;  %2083 = vmatpush3.msra.mxu1 %v2824_v29 }
 0x240   :  { %910 = vmatprep.subr.mxu0 %v2618_v57  ;;  %2084 = vmatprep.subr.mxu1 %v3820_v42 }
 0x241   :  { %911 = vmatpush1.msra.mxu0 %v2624_v58  ;;  %2085 = vmatpush3.msra.mxu1 %v2832_v30 }
 0x242   :  { %912 = vmatprep.subr.mxu0 %v2630_v59  ;;  %2086 = vmatprep.subr.mxu1 %v3820_v42 }
 0x243   :  { %913 = vmatpush1.msra.mxu0 %v2640_v61  ;;  %2087 = vmatpush3.msra.mxu1 %v2841_v31 }
 0x244   :  { %914 = vmatprep.subr.mxu0 %v2652_v63  ;;  %2088 = vmatprep.subr.mxu1 %v3820_v42 }
 0x245   :  { %915 = vmatpush1.msra.mxu0 %v2658_v0  ;;  %2089 = vmatpush3.msra.mxu1 %v2850_v32 }
 0x246   :  { %916 = vmatprep.subr.mxu0 %v2664_v1  ;;  %2090 = vmatprep.subr.mxu1 %v3820_v42 }
 0x247   :  { %917 = vmatpush1.msra.mxu0 %v2674_v4  ;;  %2091 = vmatpush3.msra.mxu1 %v2857_v33 }
 0x248   :  { %918 = vmatprep.subr.mxu0 %v2686_v6  ;;  %2092 = vmatprep.subr.mxu1 %v3820_v42 }
 0x249   :  { %919 = vmatpush1.msra.mxu0 %v2692_v7  ;;  %2093 = vmatpush3.msra.mxu1 %v2866_v34 }
 0x24a   :  { %920 = vmatprep.subr.mxu0 %v2698_v8  ;;  %2094 = vmatprep.subr.mxu1 %v3820_v42 }
 0x24b   :  { %921 = vmatpush1.msra.mxu0 %v2708_v10  ;;  %2095 = vmatpush3.msra.mxu1 %v2875_v35 }
 0x24c   :  { %922 = vmatprep.subr.mxu0 %v2718_v12  ;;  %2096 = vmatprep.subr.mxu1 %v3820_v42 }
 0x24d   :  { %923 = vmatpush1.msra.mxu0 %v2724_v13  ;;  %2097 = vmatpush3.msra.mxu1 %v2884_v36 }
 0x24e   :  { %924 = vmatprep.subr.mxu0 %v2730_v14  ;;  %2098 = vmatprep.subr.mxu1 %v3820_v42 }
 0x24f   :  { %925 = vmatpush1.msra.mxu0 %v2736_v15  ;;  %2099 = vmatpush3.msra.mxu1 %v2893_v37 }
 0x250   :  { %926 = vmatprep.subr.mxu0 %v2746_v17  ;;  %2100 = vmatprep.subr.mxu1 %v3820_v42 }
 0x251   :  { %927 = vmatpush1.msra.mxu0 %v2752_v18  ;;  %2101 = vmatpush3.msra.mxu1 %v2902_v38 }
 0x252   :  { %928 = vmatprep.subr.mxu0 %v2759_v19  ;;  %2102 = vmatprep.subr.mxu1 %v3820_v42 }
 0x253   :  { %929 = vmatpush1.msra.mxu0 %v2766_v20  ;;  %2103 = vmatpush3.msra.mxu1 %v2911_v39 }
 0x254   :  { %930 = vmatprep.subr.mxu0 %v2781_v23  ;;  %2104 = vmatprep.subr.mxu1 %v3820_v42 }
 0x255   :  { %931 = vmatpush1.msra.mxu0 %v3829_v46  ;;  %2105 = vmatpush3.msra.mxu1 %v3830_v24 }
 0x256   :  { %932 = vmatprep.subr.mxu0 %v3831_v25  ;;  %2106 = vmatprep.subr.mxu1 %v3820_v42 }
 0x257   :  { %933 = vmatpush1.msra.mxu0 %v3832_v44  ;;  %966 = vmatprep.mubr.f32.mxu0 %v3820_v42  ;;  %v3837_v44 = vld [vmem:[#allocation26_spill] sm:$0xff] }
 0x258   :  { %2107 = vmatpush3.msra.mxu1 %v3833_v3  ;;  %2108 = vmatprep.mubr.msk.f32.mxu1 %vm2383_vm0, %v3820_v42 }
 0x259   :  { %1070 = vmatprep.subr.mxu0 %v3834_v41  ;;  %2111 = vmatprep.subr.mxu1 %v3820_v42 }
 0x2f8   :  { %v800_v22 = vpop.f32.mrf.mxu0  ;;  %v871_v16 = vpop.f32.mrf.mxu1 }
 0x2f9   :  { %v875_v26 = vadd.f32 %v800_v22, %v3835_v43  ;;  %v889_v62 = vadd.f32 %v3036_v45, %v871_v16  ;;  %v3328_v16 = vld [vmem:[%s3770_s2 + $0x138] sm:$0xff] }
 0x2fa   :  { %v2075_v40 = vpop.f32.mrf.mxu1  ;;  %v802_v60 = vpop.f32.mrf.mxu0 }
 0x2fb   :  { %v1749_v56 = vmul.f32 -1.442695, %v875_v26  ;;  %v882_v48 = vadd.f32 %v802_v60, %v3836_v5  ;;  %v3342_v60 = vld [vmem:[%s3770_s2 + $0x120] sm:$0xff]  ;;  %v3356_v5 = vld [vmem:[%s3770_s2 + $0x108] sm:$0xff] }
 0x2fd   :  { %2273 = vpow2.f32 %v1749_v56  ;;  %v1750_v9 = vmul.f32 -1.442695, %v882_v48  ;;  %v3370_v48 = vld [vmem:[%s3770_s2 + $0xf0] sm:$0xff] }
 0x2ff   :  { %2275 = vpow2.f32 %v1750_v9  ;;  %v3384_v9 = vld [vmem:[%s3770_s2 + $0xd8] sm:$0xff] }
 0x30a   :  { %v2274_v2 = vpop.eup %2273 }
 0x30b   :  { %v879_v54 = vadd.f32 1.0, %v2274_v2  ;;  %v3398_v2 = vld [vmem:[%s3770_s2 + $0xc0] sm:$0xff] }
 0x30c   :  { %v2276_v50 = vpop.eup %2275 }
 0x30d   :  { %2277 = vrcp.f32 %v879_v54  ;;  %v886_v24 = vadd.f32 1.0, %v2276_v50  ;;  %v3412_v54 = vld [vmem:[%s3770_s2 + $0xa8] sm:$0xff]  ;;  %v3426_v50 = vld [vmem:[%s3770_s2 + $0x90] sm:$0xff] }
 0x31a   :  { %v2278_v41 = vpop.eup %2277 }
 0x31b   :  { %v890_v3 = vmul.f32 %v2278_v41, %v889_v62  ;;  %v3440_v62 = vld [vmem:[%s3770_s2 + $0x78] sm:$0xff]  ;;  %v3454_v41 = vld [vmem:[%s3770_s2 + $0x60] sm:$0xff] }
 0x31d   :  { %v891_v25 = vadd.f32 %v890_v3, %v3837_v44  ;;  %v3314_v44 = vld [vmem:[%s3770_s2 + $0x150] sm:$0xff]  ;;  %v3321_v3 = vld [vmem:[%s3770_s2 + $0x140] sm:$0xff] }
 0x31f   :  { %2279 = vtanh.f32 %v891_v25  ;;  %v3307_v25 = vld [vmem:[%s3770_s2 + $0x158] sm:$0xff] }
 0x320   :  { %2281 = vrcp.f32 %v886_v24  ;;  %v3210_v24 = vld [vmem:[%s3770_s2 + $0x168] sm:$0xff] }
 0x32c   :  { %v2280_v22 = vpop.eup %2279 }
 0x32d   :  { %v893_v43 = vsub.f32 %v3119_v11, %v2280_v22  ;;  %v2282_v26 = vpop.eup %2281 }
 0x32f   :  { %v894_v40 = vmul.f32 %v2282_v26, %v893_v43  ;;  %v3482_v43 = vld [vmem:[%s3770_s2 + $0x30] sm:$0xff]  ;;  %v3496_v26 = vld [vmem:[%s3770_s2 + $0x18] sm:$0xff] }
 0x330   :  { %3845 = vst [vmem:[#allocation10_spill] sm:$0xff] %v3496_v26 }
 0x331   :  { %v3199_v56 = vadd.f32 %v2280_v22, %v894_v40  ;;  %v3468_v22 = vld [vmem:[%s3770_s2 + $0x48] sm:$0xff]  ;;  %v3510_v40 = vld [vmem:[%s3770_s2] sm:$0xff] }
 0x332   :  { %3847 = vst [vmem:[#allocation22_spill] sm:$0xff] %v3510_v40 }
 0x333   :  { %1751 = vst [vmem:[%s3773_s5 + $0x10] sm:$0xff] %v3199_v56  ;;  %967 = vmatmul.mubr.f32.vlgmr.msra.gmra.mxu0 %v3199_v56  ;;  %2109 = vmatmul.mubr.f32.vlgmr.msra.gmra.mxu1 %v3199_v56 }
 0x334   :  { %1071 = vmatpush1.msra.mxu0 %v3210_v24  ;;  %2112 = vmatpush3.msra.mxu1 %v2771_v21 }
 0x335   :  { %1072 = vmatprep.subr.mxu0 %v2562_v47  ;;  %2113 = vmatprep.subr.mxu1 %v3820_v42  ;;  %v3838_v47 = vld [vmem:[#allocation8_spill] sm:$0xff] }
 0x336   :  { %1073 = vmatpush1.msra.mxu0 %v2572_v49  ;;  %2114 = vmatpush3.msra.mxu1 %v2806_v27  ;;  %v3839_v49 = vld [vmem:[#allocation6_spill] sm:$0xff] }
 0x337   :  { %1074 = vmatprep.subr.mxu0 %v2584_v51  ;;  %2115 = vmatprep.subr.mxu1 %v3820_v42  ;;  %v3840_v51 = vld [vmem:[#allocation7_spill] sm:$0xff] }
 0x338   :  { %1075 = vmatpush1.msra.mxu0 %v2590_v52  ;;  %2116 = vmatpush3.msra.mxu1 %v2815_v28  ;;  %v3841_v52 = vld [vmem:[#allocation9_spill] sm:$0xff] }
 0x339   :  { %1076 = vmatprep.subr.mxu0 %v2596_v53  ;;  %2117 = vmatprep.subr.mxu1 %v3820_v42  ;;  %v3280_v53 = vld [vmem:[%s3770_s2 + $0x170] sm:$0xff] }
 0x33a   :  { %1077 = vmatpush1.msra.mxu0 %v2606_v55  ;;  %2118 = vmatpush3.msra.mxu1 %v2824_v29 }
 0x33b   :  { %1078 = vmatprep.subr.mxu0 %v2618_v57  ;;  %2119 = vmatprep.subr.mxu1 %v3820_v42 }
 0x33c   :  { %1079 = vmatpush1.msra.mxu0 %v2624_v58  ;;  %2120 = vmatpush3.msra.mxu1 %v2832_v30  ;;  %v3842_v58 = vld [vmem:[#allocation14_spill] sm:$0xff] }
 0x33d   :  { %1080 = vmatprep.subr.mxu0 %v2630_v59  ;;  %2121 = vmatprep.subr.mxu1 %v3820_v42 }
 0x33e   :  { %1081 = vmatpush1.msra.mxu0 %v2640_v61  ;;  %2122 = vmatpush3.msra.mxu1 %v2841_v31 }
 0x33f   :  { %1082 = vmatprep.subr.mxu0 %v2652_v63  ;;  %2123 = vmatprep.subr.mxu1 %v3820_v42 }
 0x340   :  { %1083 = vmatpush1.msra.mxu0 %v2658_v0  ;;  %2124 = vmatpush3.msra.mxu1 %v2850_v32 }
 0x341   :  { %1084 = vmatprep.subr.mxu0 %v2664_v1  ;;  %2125 = vmatprep.subr.mxu1 %v3820_v42  ;;  %v3843_v1 = vld [vmem:[#allocation15_spill] sm:$0xff] }
 0x342   :  { %1085 = vmatpush1.msra.mxu0 %v2674_v4  ;;  %2126 = vmatpush3.msra.mxu1 %v2857_v33 }
 0x343   :  { %1086 = vmatprep.subr.mxu0 %v2686_v6  ;;  %2127 = vmatprep.subr.mxu1 %v3820_v42 }
 0x344   :  { %1087 = vmatpush1.msra.mxu0 %v2692_v7  ;;  %2128 = vmatpush3.msra.mxu1 %v2866_v34 }
 0x345   :  { %1088 = vmatprep.subr.mxu0 %v2698_v8  ;;  %2129 = vmatprep.subr.mxu1 %v3820_v42 }
 0x346   :  { %1089 = vmatpush1.msra.mxu0 %v2708_v10  ;;  %2130 = vmatpush3.msra.mxu1 %v2875_v35 }
 0x347   :  { %1090 = vmatprep.subr.mxu0 %v2718_v12  ;;  %2131 = vmatprep.subr.mxu1 %v3820_v42 }
 0x348   :  { %1091 = vmatpush1.msra.mxu0 %v2724_v13  ;;  %2132 = vmatpush3.msra.mxu1 %v2884_v36 }
 0x349   :  { %1092 = vmatprep.subr.mxu0 %v2730_v14  ;;  %2133 = vmatprep.subr.mxu1 %v3820_v42 }
 0x34a   :  { %1093 = vmatpush1.msra.mxu0 %v2736_v15  ;;  %2134 = vmatpush3.msra.mxu1 %v2893_v37  ;;  %v3844_v15 = vld [vmem:[#allocation25_spill] sm:$0xff] }
 0x34b   :  { %1094 = vmatprep.subr.mxu0 %v2746_v17  ;;  %2135 = vmatprep.subr.mxu1 %v3820_v42 }
 0x34c   :  { %1095 = vmatpush1.msra.mxu0 %v2752_v18  ;;  %2136 = vmatpush3.msra.mxu1 %v2902_v38 }
 0x34d   :  { %1096 = vmatprep.subr.mxu0 %v2759_v19  ;;  %2137 = vmatprep.subr.mxu1 %v3820_v42 }
 0x34e   :  { %1097 = vmatpush1.msra.mxu0 %v2766_v20  ;;  %2138 = vmatpush3.msra.mxu1 %v2911_v39 }
 0x34f   :  { %1098 = vmatprep.subr.mxu0 %v2781_v23  ;;  %2139 = vmatprep.subr.mxu1 %v3820_v42 }
 0x350   :  { %1099 = vmatpush1.msra.mxu0 %v3829_v46  ;;  %2140 = vmatpush3.msra.mxu1 %v3838_v47  ;;  %v3301_v46 = vld [vmem:[%s3770_s2 + $0x178] sm:$0xff] }
 0x351   :  { %1100 = vmatprep.subr.mxu0 %v3839_v49  ;;  %2141 = vmatprep.subr.mxu1 %v3820_v42  ;;  %v3848_v49 = vld [vmem:[#allocation16_spill] sm:$0xff] }
 0x352   :  { %1101 = vmatpush1.msra.mxu0 %v3840_v51  ;;  %1134 = vmatprep.mubr.f32.mxu0 %v3820_v42 }
 0x353   :  { %2142 = vmatpush3.msra.mxu1 %v3841_v52  ;;  %2143 = vmatprep.mubr.msk.f32.mxu1 %vm2383_vm0, %v3820_v42 }
 0x354   :  { %1238 = vmatprep.subr.mxu0 %v3280_v53  ;;  %2146 = vmatprep.subr.mxu1 %v3820_v42 }
 0x3f3   :  { %v968_v55 = vpop.f32.mrf.mxu0  ;;  %v1039_v57 = vpop.f32.mrf.mxu1 }
 0x3f4   :  { %v1043_v59 = vadd.f32 %v968_v55, %v3842_v58  ;;  %v1057_v12 = vadd.f32 %v3036_v45, %v1039_v57 }
 0x3f5   :  { %v2110_v61 = vpop.f32.mrf.mxu1  ;;  %v970_v0 = vpop.f32.mrf.mxu0 }
 0x3f6   :  { %v1752_v63 = vmul.f32 -1.442695, %v1043_v59  ;;  %v1050_v4 = vadd.f32 %v970_v0, %v3843_v1  ;;  %v3849_v59 = vld [vmem:[#allocation17_spill] sm:$0xff] }
 0x3f8   :  { %2283 = vpow2.f32 %v1752_v63  ;;  %v1753_v6 = vmul.f32 -1.442695, %v1050_v4 }
 0x3fa   :  { %2285 = vpow2.f32 %v1753_v6 }
 0x405   :  { %v2284_v7 = vpop.eup %2283 }
 0x406   :  { %v1047_v8 = vadd.f32 1.0, %v2284_v7 }
 0x407   :  { %v2286_v10 = vpop.eup %2285 }
 0x408   :  { %2287 = vrcp.f32 %v1047_v8  ;;  %v1054_v18 = vadd.f32 1.0, %v2286_v10  ;;  %v3850_v8 = vld [vmem:[#allocation28_spill] sm:$0xff] }
 0x415   :  { %v2288_v13 = vpop.eup %2287 }
 0x416   :  { %v1058_v14 = vmul.f32 %v2288_v13, %v1057_v12 }
 0x418   :  { %v1059_v17 = vadd.f32 %v1058_v14, %v3844_v15 }
 0x41a   :  { %2289 = vtanh.f32 %v1059_v17 }
 0x41b   :  { %2291 = vrcp.f32 %v1054_v18 }
 0x427   :  { %v2290_v19 = vpop.eup %2289 }
 0x428   :  { %v1061_v20 = vsub.f32 %v3199_v56, %v2290_v19  ;;  %v2292_v21 = vpop.eup %2291 }
 0x42a   :  { %v1062_v23 = vmul.f32 %v2292_v21, %v1061_v20  ;;  %v3549_v20 = vld [vmem:[%s3770_s2 + $0x148] sm:$0xff]  ;;  %v3558_v21 = vld [vmem:[%s3770_s2 + $0x130] sm:$0xff] }
 0x42c   :  { %v3289_v11 = vadd.f32 %v2290_v19, %v1062_v23  ;;  %v3540_v19 = vld [vmem:[%s3770_s2 + $0x160] sm:$0xff]  ;;  %v3567_v23 = vld [vmem:[%s3770_s2 + $0x118] sm:$0xff] }
 0x42e   :  { %1754 = vst [vmem:[%s3773_s5 + $0x18] sm:$0xff] %v3289_v11  ;;  %1135 = vmatmul.mubr.f32.vlgmr.msra.gmra.mxu0 %v3289_v11  ;;  %2144 = vmatmul.mubr.f32.vlgmr.msra.gmra.mxu1 %v3289_v11 }
 0x42f   :  { %1239 = vmatpush1.msra.mxu0 %v3210_v24  ;;  %2147 = vmatpush3.msra.mxu1 %v3301_v46 }
 0x430   :  { %1240 = vmatprep.subr.mxu0 %v3307_v25  ;;  %2148 = vmatprep.subr.mxu1 %v3820_v42 }
 0x431   :  { %1241 = vmatpush1.msra.mxu0 %v3314_v44  ;;  %2149 = vmatpush3.msra.mxu1 %v2806_v27  ;;  %v3335_v27 = vld [vmem:[%s3770_s2 + $0x128] sm:$0xff] }
 0x432   :  { %1242 = vmatprep.subr.mxu0 %v3321_v3  ;;  %2150 = vmatprep.subr.mxu1 %v3820_v42 }
 0x433   :  { %1243 = vmatpush1.msra.mxu0 %v3328_v16  ;;  %2151 = vmatpush3.msra.mxu1 %v2815_v28  ;;  %v3349_v28 = vld [vmem:[%s3770_s2 + $0x110] sm:$0xff] }
 0x434   :  { %1244 = vmatprep.subr.mxu0 %v3335_v27  ;;  %2152 = vmatprep.subr.mxu1 %v3820_v42 }
 0x435   :  { %1245 = vmatpush1.msra.mxu0 %v3342_v60  ;;  %2153 = vmatpush3.msra.mxu1 %v2824_v29  ;;  %v3363_v29 = vld [vmem:[%s3770_s2 + $0xf8] sm:$0xff] }
 0x436   :  { %1246 = vmatprep.subr.mxu0 %v3349_v28  ;;  %2154 = vmatprep.subr.mxu1 %v3820_v42 }
 0x437   :  { %1247 = vmatpush1.msra.mxu0 %v3356_v5  ;;  %2155 = vmatpush3.msra.mxu1 %v2832_v30  ;;  %v3377_v30 = vld [vmem:[%s3770_s2 + $0xe0] sm:$0xff] }
 0x438   :  { %1248 = vmatprep.subr.mxu0 %v3363_v29  ;;  %2156 = vmatprep.subr.mxu1 %v3820_v42 }
 0x439   :  { %1249 = vmatpush1.msra.mxu0 %v3370_v48  ;;  %2157 = vmatpush3.msra.mxu1 %v2841_v31  ;;  %v3391_v31 = vld [vmem:[%s3770_s2 + $0xc8] sm:$0xff] }
 0x43a   :  { %1250 = vmatprep.subr.mxu0 %v3377_v30  ;;  %2158 = vmatprep.subr.mxu1 %v3820_v42 }
 0x43b   :  { %1251 = vmatpush1.msra.mxu0 %v3384_v9  ;;  %2159 = vmatpush3.msra.mxu1 %v2850_v32  ;;  %v3405_v32 = vld [vmem:[%s3770_s2 + $0xb0] sm:$0xff] }
 0x43c   :  { %1252 = vmatprep.subr.mxu0 %v3391_v31  ;;  %2160 = vmatprep.subr.mxu1 %v3820_v42 }
 0x43d   :  { %1253 = vmatpush1.msra.mxu0 %v3398_v2  ;;  %2161 = vmatpush3.msra.mxu1 %v2857_v33  ;;  %v3419_v33 = vld [vmem:[%s3770_s2 + $0x98] sm:$0xff] }
 0x43e   :  { %1254 = vmatprep.subr.mxu0 %v3405_v32  ;;  %2162 = vmatprep.subr.mxu1 %v3820_v42 }
 0x43f   :  { %1255 = vmatpush1.msra.mxu0 %v3412_v54  ;;  %2163 = vmatpush3.msra.mxu1 %v2866_v34  ;;  %v3433_v34 = vld [vmem:[%s3770_s2 + $0x80] sm:$0xff] }
 0x440   :  { %1256 = vmatprep.subr.mxu0 %v3419_v33  ;;  %2164 = vmatprep.subr.mxu1 %v3820_v42 }
 0x441   :  { %1257 = vmatpush1.msra.mxu0 %v3426_v50  ;;  %2165 = vmatpush3.msra.mxu1 %v2875_v35  ;;  %v3447_v35 = vld [vmem:[%s3770_s2 + $0x68] sm:$0xff] }
 0x442   :  { %1258 = vmatprep.subr.mxu0 %v3433_v34  ;;  %2166 = vmatprep.subr.mxu1 %v3820_v42 }
 0x443   :  { %1259 = vmatpush1.msra.mxu0 %v3440_v62  ;;  %2167 = vmatpush3.msra.mxu1 %v2884_v36  ;;  %v3461_v36 = vld [vmem:[%s3770_s2 + $0x50] sm:$0xff] }
 0x444   :  { %1260 = vmatprep.subr.mxu0 %v3447_v35  ;;  %2168 = vmatprep.subr.mxu1 %v3820_v42 }
 0x445   :  { %1261 = vmatpush1.msra.mxu0 %v3454_v41  ;;  %2169 = vmatpush3.msra.mxu1 %v2893_v37  ;;  %v3475_v37 = vld [vmem:[%s3770_s2 + $0x38] sm:$0xff] }
 0x446   :  { %1262 = vmatprep.subr.mxu0 %v3461_v36  ;;  %2170 = vmatprep.subr.mxu1 %v3820_v42 }
 0x447   :  { %1263 = vmatpush1.msra.mxu0 %v3468_v22  ;;  %2171 = vmatpush3.msra.mxu1 %v2902_v38  ;;  %v3489_v38 = vld [vmem:[%s3770_s2 + $0x20] sm:$0xff] }
 0x448   :  { %1264 = vmatprep.subr.mxu0 %v3475_v37  ;;  %2172 = vmatprep.subr.mxu1 %v3820_v42 }
 0x449   :  { %1265 = vmatpush1.msra.mxu0 %v3482_v43  ;;  %2173 = vmatpush3.msra.mxu1 %v2911_v39  ;;  %v3503_v39 = vld [vmem:[%s3770_s2 + $0x8] sm:$0xff] }
 0x44a   :  { %1266 = vmatprep.subr.mxu0 %v3489_v38  ;;  %2174 = vmatprep.subr.mxu1 %v3820_v42  ;;  %3846 = vst [vmem:[#allocation11_spill] sm:$0xff] %v3503_v39 }
 0x44b   :  { %1267 = vmatpush1.msra.mxu0 %v3496_v26  ;;  %2175 = vmatpush3.msra.mxu1 %v3838_v47 }
 0x44c   :  { %1268 = vmatprep.subr.mxu0 %v3503_v39  ;;  %2176 = vmatprep.subr.mxu1 %v3820_v42 }
 0x44d   :  { %1269 = vmatpush1.msra.mxu0 %v3510_v40  ;;  %1302 = vmatprep.mubr.f32.mxu0 %v3820_v42 }
 0x44e   :  { %2177 = vmatpush3.msra.mxu1 %v3841_v52  ;;  %2178 = vmatprep.mubr.msk.f32.mxu1 %vm2383_vm0, %v3820_v42 }
 0x44f   :  { %1406 = vmatprep.subr.mxu0 %v3280_v53  ;;  %2181 = vmatprep.subr.mxu1 %v3820_v42 }
 0x4ee   :  { %v1136_v56 = vpop.f32.mrf.mxu0  ;;  %v1207_v47 = vpop.f32.mrf.mxu1 }
 0x4ef   :  { %v1211_v51 = vadd.f32 %v1136_v56, %v3848_v49  ;;  %v1225_v4 = vadd.f32 %v3036_v45, %v1207_v47  ;;  %v3585_v56 = vld [vmem:[%s3770_s2 + $0xe8] sm:$0xff]  ;;  %v3594_v47 = vld [vmem:[%s3770_s2 + $0xd0] sm:$0xff]  ;;  %v3603_v49 = vld [vmem:[%s3770_s2 + $0xb8] sm:$0xff] }
 0x4f0   :  { %v2145_v55 = vpop.f32.mrf.mxu1  ;;  %v1138_v58 = vpop.f32.mrf.mxu0 }
 0x4f1   :  { %v1755_v57 = vmul.f32 -1.442695, %v1211_v51  ;;  %v1218_v61 = vadd.f32 %v1138_v58, %v3849_v59  ;;  %v3612_v51 = vld [vmem:[%s3770_s2 + $0xa0] sm:$0xff]  ;;  %v3621_v55 = vld [vmem:[%s3770_s2 + $0x88] sm:$0xff]  ;;  %v3639_v58 = vld [vmem:[%s3770_s2 + $0x58] sm:$0xff] }
 0x4f2   :  { %v3648_v59 = vld [vmem:[%s3770_s2 + $0x40] sm:$0xff] }
 0x4f3   :  { %2293 = vpow2.f32 %v1755_v57  ;;  %v1756_v63 = vmul.f32 -1.442695, %v1218_v61  ;;  %v3630_v57 = vld [vmem:[%s3770_s2 + $0x70] sm:$0xff]  ;;  %v3657_v61 = vld [vmem:[%s3770_s2 + $0x28] sm:$0xff] }
 0x4f4   :  { %3851 = vst [vmem:[#allocation5_spill] sm:$0xff] %v3657_v61 }
 0x4f5   :  { %2295 = vpow2.f32 %v1756_v63  ;;  %v3667_v63 = vld [vmem:[%s3770_s2 + $0x10] sm:$0xff] }
 0x4f6   :  { %3852 = vst [vmem:[#allocation4_spill] sm:$0xff] %v3667_v63 }
 0x500   :  { %v2294_v0 = vpop.eup %2293 }
 0x501   :  { %v1215_v52 = vadd.f32 1.0, %v2294_v0 }
 0x502   :  { %v2296_v1 = vpop.eup %2295 }
 0x503   :  { %2297 = vrcp.f32 %v1215_v52  ;;  %v1222_v12 = vadd.f32 1.0, %v2296_v1  ;;  %v3853_v1 = vld [vmem:[#allocation18_spill] sm:$0xff] }
 0x510   :  { %v2298_v6 = vpop.eup %2297 }
 0x511   :  { %v1226_v7 = vmul.f32 %v2298_v6, %v1225_v4 }
 0x513   :  { %v1227_v10 = vadd.f32 %v1226_v7, %v3850_v8 }
 0x515   :  { %2299 = vtanh.f32 %v1227_v10  ;;  %v3854_v10 = vld [vmem:[#allocation19_spill] sm:$0xff] }
 0x516   :  { %2301 = vrcp.f32 %v1222_v12 }
 0x522   :  { %v2300_v13 = vpop.eup %2299 }
 0x523   :  { %v1229_v14 = vsub.f32 %v3289_v11, %v2300_v13  ;;  %v2302_v15 = vpop.eup %2301  ;;  %v3576_v11 = vld [vmem:[%s3770_s2 + $0x100] sm:$0xff] }
 0x525   :  { %v1230_v17 = vmul.f32 %v2302_v15, %v1229_v14 }
 0x527   :  { %v3524_v18 = vadd.f32 %v2300_v13, %v1230_v17 }
 0x529   :  { %1757 = vst [vmem:[%s3773_s5 + $0x20] sm:$0xff] %v3524_v18  ;;  %1303 = vmatmul.mubr.f32.vlgmr.msra.gmra.mxu0 %v3524_v18  ;;  %2179 = vmatmul.mubr.f32.vlgmr.msra.gmra.mxu1 %v3524_v18 }
 0x52a   :  { %1407 = vmatpush1.msra.mxu0 %v3210_v24  ;;  %2182 = vmatpush3.msra.mxu1 %v3301_v46 }
 0x52b   :  { %1408 = vmatprep.subr.mxu0 %v3307_v25  ;;  %2183 = vmatprep.subr.mxu1 %v3820_v42 }
 0x52c   :  { %1409 = vmatpush1.msra.mxu0 %v3314_v44  ;;  %2184 = vmatpush3.msra.mxu1 %v3540_v19 }
 0x52d   :  { %1410 = vmatprep.subr.mxu0 %v3321_v3  ;;  %2185 = vmatprep.subr.mxu1 %v3820_v42 }
 0x52e   :  { %1411 = vmatpush1.msra.mxu0 %v3328_v16  ;;  %2186 = vmatpush3.msra.mxu1 %v3549_v20 }
 0x52f   :  { %1412 = vmatprep.subr.mxu0 %v3335_v27  ;;  %2187 = vmatprep.subr.mxu1 %v3820_v42 }
 0x530   :  { %1413 = vmatpush1.msra.mxu0 %v3342_v60  ;;  %2188 = vmatpush3.msra.mxu1 %v3558_v21 }
 0x531   :  { %1414 = vmatprep.subr.mxu0 %v3349_v28  ;;  %2189 = vmatprep.subr.mxu1 %v3820_v42 }
 0x532   :  { %1415 = vmatpush1.msra.mxu0 %v3356_v5  ;;  %2190 = vmatpush3.msra.mxu1 %v3567_v23 }
 0x533   :  { %1416 = vmatprep.subr.mxu0 %v3363_v29  ;;  %2191 = vmatprep.subr.mxu1 %v3820_v42 }
 0x534   :  { %1417 = vmatpush1.msra.mxu0 %v3370_v48  ;;  %2192 = vmatpush3.msra.mxu1 %v3576_v11 }
 0x535   :  { %1418 = vmatprep.subr.mxu0 %v3377_v30  ;;  %2193 = vmatprep.subr.mxu1 %v3820_v42 }
 0x536   :  { %1419 = vmatpush1.msra.mxu0 %v3384_v9  ;;  %2194 = vmatpush3.msra.mxu1 %v3585_v56 }
 0x537   :  { %1420 = vmatprep.subr.mxu0 %v3391_v31  ;;  %2195 = vmatprep.subr.mxu1 %v3820_v42 }
 0x538   :  { %1421 = vmatpush1.msra.mxu0 %v3398_v2  ;;  %2196 = vmatpush3.msra.mxu1 %v3594_v47 }
 0x539   :  { %1422 = vmatprep.subr.mxu0 %v3405_v32  ;;  %2197 = vmatprep.subr.mxu1 %v3820_v42 }
 0x53a   :  { %1423 = vmatpush1.msra.mxu0 %v3412_v54  ;;  %2198 = vmatpush3.msra.mxu1 %v3603_v49 }
 0x53b   :  { %1424 = vmatprep.subr.mxu0 %v3419_v33  ;;  %2199 = vmatprep.subr.mxu1 %v3820_v42 }
 0x53c   :  { %1425 = vmatpush1.msra.mxu0 %v3426_v50  ;;  %2200 = vmatpush3.msra.mxu1 %v3612_v51 }
 0x53d   :  { %1426 = vmatprep.subr.mxu0 %v3433_v34  ;;  %2201 = vmatprep.subr.mxu1 %v3820_v42 }
 0x53e   :  { %1427 = vmatpush1.msra.mxu0 %v3440_v62  ;;  %2202 = vmatpush3.msra.mxu1 %v3621_v55 }
 0x53f   :  { %1428 = vmatprep.subr.mxu0 %v3447_v35  ;;  %2203 = vmatprep.subr.mxu1 %v3820_v42 }
 0x540   :  { %1429 = vmatpush1.msra.mxu0 %v3454_v41  ;;  %2204 = vmatpush3.msra.mxu1 %v3630_v57 }
 0x541   :  { %1430 = vmatprep.subr.mxu0 %v3461_v36  ;;  %2205 = vmatprep.subr.mxu1 %v3820_v42 }
 0x542   :  { %1431 = vmatpush1.msra.mxu0 %v3468_v22  ;;  %2206 = vmatpush3.msra.mxu1 %v3639_v58 }
 0x543   :  { %1432 = vmatprep.subr.mxu0 %v3475_v37  ;;  %2207 = vmatprep.subr.mxu1 %v3820_v42 }
 0x544   :  { %1433 = vmatpush1.msra.mxu0 %v3482_v43  ;;  %2208 = vmatpush3.msra.mxu1 %v3648_v59 }
 0x545   :  { %1434 = vmatprep.subr.mxu0 %v3489_v38  ;;  %2209 = vmatprep.subr.mxu1 %v3820_v42 }
 0x546   :  { %1435 = vmatpush1.msra.mxu0 %v3496_v26  ;;  %2210 = vmatpush3.msra.mxu1 %v3657_v61 }
 0x547   :  { %1436 = vmatprep.subr.mxu0 %v3503_v39  ;;  %2211 = vmatprep.subr.mxu1 %v3820_v42  ;;  %v3855_v39 = vld [vmem:[#allocation27_spill] sm:$0xff] }
 0x548   :  { %1437 = vmatpush1.msra.mxu0 %v3510_v40  ;;  %1470 = vmatprep.mubr.f32.mxu0 %v3820_v42 }
 0x549   :  { %2212 = vmatpush3.msra.mxu1 %v3667_v63  ;;  %2213 = vmatprep.mubr.msk.f32.mxu1 %vm2383_vm0, %v3820_v42 }
 0x54a   :  { %1574 = vmatprep.subr.mxu0 %v3280_v53  ;;  %2216 = vmatprep.subr.mxu1 %v3820_v42 }
 0x5e9   :  { %v1304_v0 = vpop.f32.mrf.mxu0  ;;  %v1375_v52 = vpop.f32.mrf.mxu1 }
 0x5ea   :  { %v1379_v4 = vadd.f32 %v1304_v0, %v3853_v1  ;;  %v1393_v53 = vadd.f32 %v3036_v45, %v1375_v52  ;;  %v3856_v45 = vld [vmem:[#allocation10_spill] sm:$0xff] }
 0x5eb   :  { %v2180_v6 = vpop.f32.mrf.mxu1  ;;  %v1306_v8 = vpop.f32.mrf.mxu0 }
 0x5ec   :  { %v1758_v7 = vmul.f32 -1.442695, %v1379_v4  ;;  %v1386_v12 = vadd.f32 %v1306_v8, %v3854_v10 }
 0x5ee   :  { %2303 = vpow2.f32 %v1758_v7  ;;  %v1759_v13 = vmul.f32 -1.442695, %v1386_v12 }
 0x5f0   :  { %2305 = vpow2.f32 %v1759_v13 }
 0x5fb   :  { %v2304_v14 = vpop.eup %2303 }
 0x5fc   :  { %v1383_v15 = vadd.f32 1.0, %v2304_v14 }
 0x5fd   :  { %v2306_v17 = vpop.eup %2305 }
 0x5fe   :  { %2307 = vrcp.f32 %v1383_v15  ;;  %v1390_v26 = vadd.f32 1.0, %v2306_v17 }
 0x60b   :  { %v2308_v63 = vpop.eup %2307 }
 0x60c   :  { %v1394_v40 = vmul.f32 %v2308_v63, %v1393_v53 }
 0x60e   :  { %v1395_v61 = vadd.f32 %v1394_v40, %v3855_v39  ;;  %v3864_v39 = vld [vmem:[#allocation23_spill] sm:$0xff] }
 0x610   :  { %2309 = vtanh.f32 %v1395_v61 }
 0x611   :  { %2311 = vrcp.f32 %v1390_v26 }
 0x61d   :  { %v2310_v0 = vpop.eup %2309 }
 0x61e   :  { %v1397_v1 = vsub.f32 %v3524_v18, %v2310_v0  ;;  %v2312_v4 = vpop.eup %2311 }
 0x620   :  { %v1398_v6 = vmul.f32 %v2312_v4, %v1397_v1 }
 0x622   :  { %v3679_v7 = vadd.f32 %v2310_v0, %v1398_v6 }
 0x624   :  { %1760 = vst [vmem:[%s3773_s5 + $0x28] sm:$0xff] %v3679_v7  ;;  %1471 = vmatmul.mubr.f32.vlgmr.msra.gmra.mxu0 %v3679_v7  ;;  %2214 = vmatmul.mubr.f32.vlgmr.msra.gmra.mxu1 %v3679_v7 }
 0x625   :  { %1575 = vmatpush1.msra.mxu0 %v3210_v24  ;;  %2217 = vmatpush3.msra.mxu1 %v3301_v46  ;;  %v3857_v24 = vld [vmem:[#allocation5_spill] sm:$0xff]  ;;  %v3858_v46 = vld [vmem:[#allocation11_spill] sm:$0xff] }
 0x626   :  { %1576 = vmatprep.subr.mxu0 %v3307_v25  ;;  %2218 = vmatprep.subr.mxu1 %v3820_v42  ;;  %v3859_v25 = vld [vmem:[#allocation22_spill] sm:$0xff] }
 0x627   :  { %1577 = vmatpush1.msra.mxu0 %v3314_v44  ;;  %2219 = vmatpush3.msra.mxu1 %v3540_v19  ;;  %v3860_v44 = vld [vmem:[#allocation4_spill] sm:$0xff] }
 0x628   :  { %1578 = vmatprep.subr.mxu0 %v3321_v3  ;;  %2220 = vmatprep.subr.mxu1 %v3820_v42 }
 0x629   :  { %1579 = vmatpush1.msra.mxu0 %v3328_v16  ;;  %2221 = vmatpush3.msra.mxu1 %v3549_v20 }
 0x62a   :  { %1580 = vmatprep.subr.mxu0 %v3335_v27  ;;  %2222 = vmatprep.subr.mxu1 %v3820_v42  ;;  %v3861_v27 = vld [vmem:[#allocation20_spill] sm:$0xff] }
 0x62b   :  { %1581 = vmatpush1.msra.mxu0 %v3342_v60  ;;  %2223 = vmatpush3.msra.mxu1 %v3558_v21  ;;  %v3865_v21 = vld [vmem:[#allocation24_spill] sm:$0xff] }
 0x62c   :  { %1582 = vmatprep.subr.mxu0 %v3349_v28  ;;  %2224 = vmatprep.subr.mxu1 %v3820_v42 }
 0x62d   :  { %1583 = vmatpush1.msra.mxu0 %v3356_v5  ;;  %2225 = vmatpush3.msra.mxu1 %v3567_v23 }
 0x62e   :  { %1584 = vmatprep.subr.mxu0 %v3363_v29  ;;  %2226 = vmatprep.subr.mxu1 %v3820_v42 }
 0x62f   :  { %1585 = vmatpush1.msra.mxu0 %v3370_v48  ;;  %2227 = vmatpush3.msra.mxu1 %v3576_v11  ;;  %v3862_v48 = vld [vmem:[#allocation21_spill] sm:$0xff] }
 0x630   :  { %1586 = vmatprep.subr.mxu0 %v3377_v30  ;;  %2228 = vmatprep.subr.mxu1 %v3820_v42 }
 0x631   :  { %1587 = vmatpush1.msra.mxu0 %v3384_v9  ;;  %2229 = vmatpush3.msra.mxu1 %v3585_v56 }
 0x632   :  { %1588 = vmatprep.subr.mxu0 %v3391_v31  ;;  %2230 = vmatprep.subr.mxu1 %v3820_v42 }
 0x633   :  { %1589 = vmatpush1.msra.mxu0 %v3398_v2  ;;  %2231 = vmatpush3.msra.mxu1 %v3594_v47 }
 0x634   :  { %1590 = vmatprep.subr.mxu0 %v3405_v32  ;;  %2232 = vmatprep.subr.mxu1 %v3820_v42 }
 0x635   :  { %1591 = vmatpush1.msra.mxu0 %v3412_v54  ;;  %2233 = vmatpush3.msra.mxu1 %v3603_v49 }
 0x636   :  { %1592 = vmatprep.subr.mxu0 %v3419_v33  ;;  %2234 = vmatprep.subr.mxu1 %v3820_v42 }
 0x637   :  { %1593 = vmatpush1.msra.mxu0 %v3426_v50  ;;  %2235 = vmatpush3.msra.mxu1 %v3612_v51 }
 0x638   :  { %1594 = vmatprep.subr.mxu0 %v3433_v34  ;;  %2236 = vmatprep.subr.mxu1 %v3820_v42  ;;  %v3863_v34 = vld [vmem:[#allocation30_spill] sm:$0xff] }
 0x639   :  { %1595 = vmatpush1.msra.mxu0 %v3440_v62  ;;  %2237 = vmatpush3.msra.mxu1 %v3621_v55 }
 0x63a   :  { %1596 = vmatprep.subr.mxu0 %v3447_v35  ;;  %2238 = vmatprep.subr.mxu1 %v3820_v42 }
 0x63b   :  { %1597 = vmatpush1.msra.mxu0 %v3454_v41  ;;  %2239 = vmatpush3.msra.mxu1 %v3630_v57 }
 0x63c   :  { %1598 = vmatprep.subr.mxu0 %v3461_v36  ;;  %2240 = vmatprep.subr.mxu1 %v3820_v42 }
 0x63d   :  { %1599 = vmatpush1.msra.mxu0 %v3468_v22  ;;  %2241 = vmatpush3.msra.mxu1 %v3639_v58  ;;  %v3866_v58 = vld [vmem:[#allocation29_spill] sm:$0xff] }
 0x63e   :  { %1600 = vmatprep.subr.mxu0 %v3475_v37  ;;  %2242 = vmatprep.subr.mxu1 %v3820_v42 }
 0x63f   :  { %1601 = vmatpush1.msra.mxu0 %v3482_v43  ;;  %2243 = vmatpush3.msra.mxu1 %v3648_v59 }
 0x640   :  { %1602 = vmatprep.subr.mxu0 %v3489_v38  ;;  %2244 = vmatprep.subr.mxu1 %v3820_v42 }
 0x641   :  { %1603 = vmatpush1.msra.mxu0 %v3856_v45  ;;  %2245 = vmatpush3.msra.mxu1 %v3857_v24 }
 0x642   :  { %1604 = vmatprep.subr.mxu0 %v3858_v46  ;;  %2246 = vmatprep.subr.mxu1 %v3820_v42 }
 0x643   :  { %1605 = vmatpush1.msra.mxu0 %v3859_v25  ;;  %1638 = vmatprep.mubr.f32.mxu0 %v3820_v42 }
 0x644   :  { %2247 = vmatpush3.msra.mxu1 %v3860_v44  ;;  %2248 = vmatprep.mubr.msk.f32.mxu1 %vm2383_vm0, %v3820_v42  ;;  %v2381_v42 = vld [vmem:[%s3772_s4] ss:$0 sm:$0xff] }
 0x6e4   :  { %v1472_v3 = vpop.f32.mrf.mxu0  ;;  %v1543_v16 = vpop.f32.mrf.mxu1 }
 0x6e5   :  { %v1547_v60 = vadd.f32 %v1472_v3, %v3861_v27  ;;  %v1561_v54 = vadd.f32 %v2381_v42, %v1543_v16 }
 0x6e6   :  { %v2215_v28 = vpop.f32.mrf.mxu1  ;;  %v1474_v29 = vpop.f32.mrf.mxu0 }
 0x6e7   :  { %v1761_v5 = vmul.f32 -1.442695, %v1547_v60  ;;  %v1554_v30 = vadd.f32 %v1474_v29, %v3862_v48 }
 0x6e9   :  { %2313 = vpow2.f32 %v1761_v5  ;;  %v1762_v9 = vmul.f32 -1.442695, %v1554_v30 }
 0x6eb   :  { %2315 = vpow2.f32 %v1762_v9 }
 0x6f6   :  { %v2314_v31 = vpop.eup %2313 }
 0x6f7   :  { %v1551_v2 = vadd.f32 1.0, %v2314_v31 }
 0x6f8   :  { %v2316_v32 = vpop.eup %2315 }
 0x6f9   :  { %2317 = vrcp.f32 %v1551_v2  ;;  %v1558_v35 = vadd.f32 1.0, %v2316_v32 }
 0x706   :  { %v2318_v33 = vpop.eup %2317 }
 0x707   :  { %v1562_v50 = vmul.f32 %v2318_v33, %v1561_v54 }
 0x709   :  { %v1563_v62 = vadd.f32 %v1562_v50, %v3863_v34 }
 0x70b   :  { %2319 = vtanh.f32 %v1563_v62 }
 0x70c   :  { %2321 = vrcp.f32 %v1558_v35 }
 0x718   :  { %v2320_v41 = vpop.eup %2319 }
 0x719   :  { %v1565_v36 = vsub.f32 %v3679_v7, %v2320_v41  ;;  %v2322_v22 = vpop.eup %2321 }
 0x71b   :  { %v1566_v37 = vmul.f32 %v2322_v22, %v1565_v36 }
 0x71d   :  { %v1567_v43 = vadd.f32 %v2320_v41, %v1566_v37 }
 0x71f   :  { %1763 = vst [vmem:[%s3773_s5 + $0x30] sm:$0xff] %v1567_v43  ;;  %1639 = vmatmul.mubr.f32.vlgmr.msra.gmra.mxu0 %v1567_v43  ;;  %2249 = vmatmul.mubr.f32.vlgmr.msra.gmra.mxu1 %v1567_v43 }
 0x7df   :  { %v1640_v38 = vpop.f32.mrf.mxu0  ;;  %v1711_v26 = vpop.f32.mrf.mxu1 }
 0x7e0   :  { %v1715_v40 = vadd.f32 %v1640_v38, %v3864_v39  ;;  %v1729_v51 = vadd.f32 %v2381_v42, %v1711_v26 }
 0x7e1   :  { %v2250_v18 = vpop.f32.mrf.mxu1  ;;  %v1642_v20 = vpop.f32.mrf.mxu0 }
 0x7e2   :  { %v1764_v19 = vmul.f32 -1.442695, %v1715_v40  ;;  %v1722_v23 = vadd.f32 %v1642_v20, %v3865_v21 }
 0x7e4   :  { %2323 = vpow2.f32 %v1764_v19  ;;  %v1765_v11 = vmul.f32 -1.442695, %v1722_v23 }
 0x7e6   :  { %2325 = vpow2.f32 %v1765_v11 }
 0x7f1   :  { %v2324_v56 = vpop.eup %2323 }
 0x7f2   :  { %v1719_v47 = vadd.f32 1.0, %v2324_v56 }
 0x7f3   :  { %v2326_v49 = vpop.eup %2325 }
 0x7f4   :  { %2327 = vrcp.f32 %v1719_v47  ;;  %v1726_v61 = vadd.f32 1.0, %v2326_v49 }
 0x801   :  { %v2328_v55 = vpop.eup %2327 }
 0x802   :  { %v1730_v57 = vmul.f32 %v2328_v55, %v1729_v51 }
 0x804   :  { %v1731_v59 = vadd.f32 %v1730_v57, %v3866_v58 }
 0x806   :  { %2329 = vtanh.f32 %v1731_v59 }
 0x807   :  { %2331 = vrcp.f32 %v1726_v61 }
 0x813   :  { %v2330_v63 = vpop.eup %2329 }
 0x814   :  { %v1733_v52 = vsub.f32 %v1567_v43, %v2330_v63  ;;  %v2332_v8 = vpop.eup %2331 }
 0x816   :  { %v1734_v10 = vmul.f32 %v2332_v8, %v1733_v52 }
 0x818   :  { %v1735_v12 = vadd.f32 %v2330_v63, %v1734_v10 }
 0x81a   :  { %1766 = vst [vmem:[%s3773_s5 + $0x38] sm:$0xff] %v1735_v12 }

</bundles_post_ra>
